<compile_context>
chip_gen: v7x
topology: tpu7x:2x2x1
jax: 0.10.0
libtpu: 0.0.40
codegen_flags: <defaults>
</compile_context>

<pallas_src>
import jax
import jax.numpy as jnp
from jax.experimental import pallas as pl
from jax.experimental.pallas import tpu as pltpu

F_IN = 8            # num_node_features
D1, D2 = 16, 32     # GCNConv output dims
H3, C3 = 4, 32      # GATConv3: 4 heads x 32
H4, C4 = 8, 32      # GATConv4: 8 heads x 32
JUMP = D1 + D2 + H3 * C3 + H4 * C4   # 16 + 32 + 128 + 256 = 432
FC1 = 128
N_NODES = 16        # node count is fixed for this script (layout constants use it)
WIDTH_A, WIDTH_B = 128, 256


def _pad8(n):
    return -(-n // 8) * 8


# ----------------------- packed-parameter blob layout -----------------------
# Blob A: every tensor <= 128 lanes wide.  Blob B: the three 256-lane tensors.
# Offsets are static Python ints shared by the packer and the kernel; every
# section starts on a sublane-tile (multiple-of-8 row) boundary.
_A_SHAPES = (
    ('w1t', (F_IN, D1)), ('b1', (1, D1)),
    ('w2t', (D1, D2)), ('b2', (1, D2)),
    ('w3t', (D2, H3 * C3)), ('a3sd', (H3 * C3, 2 * H3)), ('b3', (1, H3 * C3)),
    ('dexp3', (H3, H3 * N_NODES)), ('seg3', (H3 * N_NODES, H3)),
    ('t3', (H3 * N_NODES, N_NODES)), ('mask3', (H3 * N_NODES, H3 * C3)),
    ('a4sd', (H4 * C4, 2 * H4)),
    ('dexp4', (H4, H4 * N_NODES)), ('seg4', (H4 * N_NODES, H4)),
    ('t4', (H4 * N_NODES, N_NODES)),
    ('psel', (N_NODES, H4 * N_NODES)),
    ('f1a', (D1, FC1)), ('f1b', (D2, FC1)),
    ('f1c', (H3 * C3, FC1)), ('f1d', (H4 * C4, FC1)),
    ('f1bias', (1, FC1)), ('f2t', (FC1, 1)), ('f2bias', (1, 1)),
)
_B_SHAPES = (
    ('w4t', (H3 * C3, H4 * C4)), ('b4', (1, H4 * C4)),
    ('mask4', (H4 * N_NODES, H4 * C4)),
)


def _make_layout(shapes):
    lay, off = {}, 0
    for name, (r, c) in shapes:
        lay[name] = (off, r, c)
        off += _pad8(r)
    return lay, off


LAY_A, ROWS_A = _make_layout(_A_SHAPES)   # ~1520 x 128 f32  (~0.78 MiB)
LAY_B, ROWS_B = _make_layout(_B_SHAPES)   # ~264 x 256 f32   (~0.27 MiB)


# --------------------------------- kernel ---------------------------------

def gnn_kernel(x_ref, adjn_ref, bias_ref, pool_ref, pA_ref, pB_ref, out_ref):
    f32 = jnp.float32

    def A(name):
        off, r, c = LAY_A[name]
        return pA_ref[off:off + r, 0:c]

    def B(name):
        off, r, c = LAY_B[name]
        return pB_ref[off:off + r, 0:c]

    x = x_ref[...]                    # [N, F_IN]
    adj_norm = adjn_ref[...]          # D^-1/2 (A+I) D^-1/2  (hoisted to wrapper)
    bias4 = bias_ref[...]             # [N, H4*N] additive edge mask, tiled per head
    pool = pool_ref[...]              # [G, N] mean-pool matrix
    psel = A('psel')                  # [N, H4*N], psel[j, h*N+j'] = (j == j')

    # ------------------------------ 2x GCNConv ------------------------------
    def gcn(h_in, wt, b):
        h = jnp.dot(h_in, wt, preferred_element_type=f32)      # X W^T
        h = jnp.dot(adj_norm, h, preferred_element_type=f32)   # normalized aggregate
        return jnp.maximum(h + b, 0.0)

    x1 = gcn(x, A('w1t'), A('b1'))                              # [N, 16]
    x2 = gcn(x1, A('w2t'), A('b2'))                             # [N, 32]

    # --------------- GATConv: all heads batched lane-densely ---------------
    # e is laid out as [N, H*N] (dst node on sublanes, (head, src) on lanes) so
    # LeakyReLU / mask / shift / exp / scale are single passes over 1-2 vregs,
    # and the per-head aggregation collapses to one block-diagonal matmul.
    def gat(h_in, wt, a_sd, b, dexp, seg, tmat, bmask, att_bias, heads):
        hn = heads * N_NODES
        hk = jnp.dot(h_in, wt, preferred_element_type=f32)              # [N, H*C]
        sd = jnp.dot(hk, a_sd, preferred_element_type=f32)              # [N, 2H] (dst | src terms)
        d_all = sd[:, 0:heads]                                          # [N, H]
        s_all = sd[:, heads:2 * heads]                                  # [N, H]
        # d-term: d_all[i,h] broadcast over this head's N lanes.
        d_term = jnp.dot(d_all, dexp, preferred_element_type=f32)       # [N, H*N]
        # s-term: s_all[j,h] placed at lane h*N+j (same for every dst row).
        s_sparse = jnp.dot(s_all, dexp, preferred_element_type=f32) * psel[:, 0:hn]
        s_term = jnp.sum(s_sparse, axis=0, keepdims=True)               # [1, H*N]
        e = d_term + s_term
        e = jnp.where(e >= 0.0, e, 0.2 * e) + att_bias                  # LeakyReLU(0.2) + edge mask
        e = e - jnp.max(e, axis=-1, keepdims=True)                      # row shift (softmax-invariant per head)
        p = jnp.exp(e)
        denom = jnp.maximum(jnp.dot(p, seg, preferred_element_type=f32), 1e-30)  # [N, H]
        inv = pl.reciprocal(denom, approx=True)                         # EUP rcp ...
        inv = inv * (2.0 - denom * inv)                                 # ... + 1 Newton step (keeps 1e-3 tol)
        alpha = p * jnp.dot(inv, dexp, preferred_element_type=f32)      # [N, H*N]
        # Block-diagonal aggregation: one matmul for all heads.
        hk_bd = jnp.dot(tmat, hk, preferred_element_type=f32) * bmask   # blockdiag(hk_h) [H*N, H*C]
        agg = jnp.dot(alpha, hk_bd, preferred_element_type=f32)         # [N, H*C]
        return jnp.maximum(agg + b, 0.0)

    x3 = gat(x2, A('w3t'), A('a3sd'), A('b3'), A('dexp3'), A('seg3'),
             A('t3'), A('mask3'), bias4[:, 0:H3 * N_NODES], H3)         # [N, 128]
    x4 = gat(x3, B('w4t'), A('a4sd'), B('b4'), A('dexp4'), A('seg4'),
             A('t4'), B('mask4'), bias4, H4)                            # [N, 256]

    # --------- JumpingKnowledge('cat') + global_mean_pool + fc1 + fc2 ---------
    #   (pool @ concat(x1..x4)) @ fc1^T == pool @ (sum_b x_b @ fc1_block_b)
    jk = jnp.dot(x1, A('f1a'), preferred_element_type=f32)
    jk = jk + jnp.dot(x2, A('f1b'), preferred_element_type=f32)
    jk = jk + jnp.dot(x3, A('f1c'), preferred_element_type=f32)
    jk = jk + jnp.dot(x4, A('f1d'), preferred_element_type=f32)          # [N, 128]
    h = jnp.dot(pool, jk, preferred_element_type=f32) + A('f1bias')      # [G, 128]
    h = jnp.maximum(h, 0.0)
    out_ref[...] = (jnp.dot(h, A('f2t'), preferred_element_type=f32)
                    + A('f2bias'))                                       # [G, 1]


# ------------------------------ host wrappers ------------------------------

def init_params(key):
    """Deterministic parameter init with PyTorch-Geometric parameter shapes."""
    ks = jax.random.split(key, 16)
    p = {}
    p['w1'] = 0.3 * jax.random.normal(ks[0], (D1, F_IN), jnp.float32)
    p['b1'] = 0.1 * jax.random.normal(ks[1], (D1,), jnp.float32)
    p['w2'] = 0.3 * jax.random.normal(ks[2], (D2, D1), jnp.float32)
    p['b2'] = 0.1 * jax.random.normal(ks[3], (D2,), jnp.float32)
    p['w3'] = 0.3 * jax.random.normal(ks[4], (H3 * C3, D2), jnp.float32)
    p['a3s'] = 0.3 * jax.random.normal(ks[5], (1, H3, C3), jnp.float32)
    p['a3d'] = 0.3 * jax.random.normal(ks[6], (1, H3, C3), jnp.float32)
    p['b3'] = 0.1 * jax.random.normal(ks[7], (H3 * C3,), jnp.float32)
    p['w4'] = 0.1 * jax.random.normal(ks[8], (H4 * C4, H3 * C3), jnp.float32)
    p['a4s'] = 0.3 * jax.random.normal(ks[9], (1, H4, C4), jnp.float32)
    p['a4d'] = 0.3 * jax.random.normal(ks[10], (1, H4, C4), jnp.float32)
    p['b4'] = 0.1 * jax.random.normal(ks[11], (H4 * C4,), jnp.float32)
    p['fc1w'] = 0.1 * jax.random.normal(ks[12], (FC1, JUMP), jnp.float32)
    p['fc1b'] = 0.1 * jax.random.normal(ks[13], (FC1,), jnp.float32)
    p['fc2w'] = 0.1 * jax.random.normal(ks[14], (1, FC1), jnp.float32)
    p['fc2b'] = 0.1 * jax.random.normal(ks[15], (1,), jnp.float32)
    return p


def _att_proj(a):
    """[1, H, C] attention vector -> [H*C, H] block-diagonal projection so that
    (hk @ A)[:, h] = sum_c hk[:, h*C+c] * a[0, h, c]."""
    H, C = a.shape[1], a.shape[2]
    a2 = a.reshape(H, C).astype(jnp.float32)
    eye = jnp.eye(H, dtype=jnp.float32)
    return (a2[:, :, None] * eye[:, None, :]).reshape(H * C, H)


def _dexp(H):
    """[H, H*N]: dexp[h, h*N + j] = 1 (per-head lane-block broadcast)."""
    return jnp.kron(jnp.eye(H, dtype=jnp.float32),
                    jnp.ones((1, N_NODES), jnp.float32))


def _blockmask(H, C):
    """[H*N, H*C]: 1 iff sublane block h matches lane block h."""
    return jnp.kron(jnp.eye(H, dtype=jnp.float32),
                    jnp.ones((N_NODES, C), jnp.float32))


def pack_kernel_params(p):
    """Re-layout PyTorch-shaped params + static head-batching helper matrices
    into TWO contiguous lane-padded f32 blobs (one DMA each)."""
    eye_n = jnp.eye(N_NODES, dtype=jnp.float32)
    fc1t = p['fc1w'].T                   # [432, 128]
    o1, o2, o3 = D1, D1 + D2, D1 + D2 + H3 * C3

    vals_a = {
        'w1t': p['w1'].T, 'b1': p['b1'].reshape(1, D1),
        'w2t': p['w2'].T, 'b2': p['b2'].reshape(1, D2),
        'w3t': p['w3'].T,
        'a3sd': jnp.concatenate([_att_proj(p['a3d']), _att_proj(p['a3s'])], axis=1),
        'b3': p['b3'].reshape(1, H3 * C3),
        'dexp3': _dexp(H3), 'seg3': _dexp(H3).T,
        't3': jnp.tile(eye_n, (H3, 1)), 'mask3': _blockmask(H3, C3),
        'a4sd': jnp.concatenate([_att_proj(p['a4d']), _att_proj(p['a4s'])], axis=1),
        'dexp4': _dexp(H4), 'seg4': _dexp(H4).T,
        't4': jnp.tile(eye_n, (H4, 1)),
        'psel': jnp.tile(eye_n, (1, H4)),
        'f1a': fc1t[0:o1], 'f1b': fc1t[o1:o2], 'f1c': fc1t[o2:o3], 'f1d': fc1t[o3:],
        'f1bias': p['fc1b'].reshape(1, FC1),
        'f2t': p['fc2w'].T, 'f2bias': p['fc2b'].reshape(1, 1),
    }
    vals_b = {
        'w4t': p['w4'].T, 'b4': p['b4'].reshape(1, H4 * C4),
        'mask4': _blockmask(H4, C4),
    }

    def build(shapes, lay, rows, width, vdict):
        blob = jnp.zeros((rows, width), jnp.float32)
        for name, (r, c) in shapes:
            off = lay[name][0]
            blob = blob.at[off:off + r, :c].set(vdict[name].astype(jnp.float32))
        return blob

    pA = build(_A_SHAPES, LAY_A, ROWS_A, WIDTH_A, vals_a)
    pB = build(_B_SHAPES, LAY_B, ROWS_B, WIDTH_B, vals_b)
    return pA, pB


@jax.jit
def deeper_enhanced_gcn_forward(x, adj, pool, pA, pB):
    # Graph preprocessing hoisted out of the kernel (review item): symmetric
    # GCN normalization and the per-head-tiled additive attention edge mask.
    deg = jnp.sum(adj, axis=-1, keepdims=True)
    dinv = jax.lax.rsqrt(jnp.maximum(deg, 1.0))
    adj_norm = (dinv * adj) * jnp.transpose(dinv)               # [N, N]
    bias = jnp.where(adj > 0.0, 0.0, -1e30)                     # [N, N]
    bias_wide = jnp.tile(bias, (1, H4))                         # [N, H4*N]

    ins = (x, adj_norm, bias_wide, pool, pA, pB)
    n_graphs = pool.shape[0]
    out = pl.pallas_call(
        gnn_kernel,
        out_shape=jax.ShapeDtypeStruct((n_graphs, 1), jnp.float32),
        in_specs=[pl.BlockSpec(memory_space=pltpu.MemorySpace.VMEM)] * len(ins),
        out_specs=pl.BlockSpec(memory_space=pltpu.MemorySpace.VMEM),
    )(*ins)
    return out[:, 0]


def reference_forward(x, adj, pool, p):
    """Pure-JAX dense reference of the PyG forward pass (for verification)."""
    deg = adj.sum(-1, keepdims=True)
    dinv = jax.lax.rsqrt(jnp.maximum(deg, 1.0))

    def gcn(h, w, b):
        h = h @ w.T
        return jax.nn.relu(dinv * (adj @ (dinv * h)) + b)

    def gat(h_in, w, a_s, a_d, b, heads, ch):
        n = h_in.shape[0]
        hh = (h_in @ w.T).reshape(n, heads, ch)
        s = (hh * a_s).sum(-1)                               # [N, H] (src)
        d = (hh * a_d).sum(-1)                               # [N, H] (dst)
        e = d[:, None, :] + s[None, :, :]                    # [dst, src, H]
        e = jnp.where(e >= 0.0, e, 0.2 * e)
        e = jnp.where(adj[:, :, None] > 0.0, e, -1e30)
        e = e - e.max(axis=1, keepdims=True)
        pe = jnp.exp(e)
        alpha = pe / pe.sum(axis=1, keepdims=True)
        out = jnp.einsum('ijh,jhc->ihc', alpha, hh)
        return jax.nn.relu(out.reshape(n, heads * ch) + b)

    x1 = gcn(x, p['w1'], p['b1'])
    x2 = gcn(x1, p['w2'], p['b2'])
    x3 = gat(x2, p['w3'], p['a3s'], p['a3d'], p['b3'], H3, C3)
    x4 = gat(x3, p['w4'], p['a4s'], p['a4d'], p['b4'], H4, C4)
    xj = jnp.concatenate([x1, x2, x3, x4], axis=-1)
    xp = pool @ xj
    h = jax.nn.relu(xp @ p['fc1w'].T + p['fc1b'])
    return (h @ p['fc2w'].T + p['fc2b']).reshape(-1)


# ----------------------------------- main -----------------------------------

if __name__ == "__main__":
    N, G = N_NODES, 2
    key = jax.random.PRNGKey(0)
    kx, kp = jax.random.split(key)
    x = jax.random.normal(kx, (N, F_IN), jnp.float32)

    # Two small graphs of 8 nodes each: ring + two chords, undirected.
    edges = []
    for off in (0, 8):
        for i in range(8):
            a, b = off + i, off + (i + 1) % 8
            edges += [(a, b), (b, a)]
        edges += [(off, off + 4), (off + 4, off),
                  (off + 2, off + 6), (off + 6, off + 2)]
    edge_index = jnp.array(edges, dtype=jnp.int32).T           # [2, E]
    batch = jnp.array([0] * 8 + [1] * 8, dtype=jnp.int32)

    # Dense adjacency adj[dst, src] (+ self loops) and mean-pool matrix.
    # TODO(synk): sparse edge_index scatter has no clean Pallas equivalent at
    # this scale; the graph is densified here on the host/XLA side.
    adj = jnp.zeros((N, N), jnp.float32)
    adj = adj.at[edge_index[1], edge_index[0]].set(1.0)
    adj = adj.at[jnp.arange(N), jnp.arange(N)].set(1.0)
    pool = jnp.zeros((G, N), jnp.float32).at[batch, jnp.arange(N)].set(1.0)
    pool = pool / pool.sum(axis=-1, keepdims=True)

    params = init_params(kp)
    pA, pB = pack_kernel_params(params)

    out = deeper_enhanced_gcn_forward(x, adj, pool, pA, pB)
    out = jax.block_until_ready(out)

    ref = reference_forward(x, adj, pool, params)
    err = float(jnp.max(jnp.abs(out - ref)))
    assert out.shape == (G,), out.shape
    assert err < 1e-3, f"kernel vs reference mismatch: {err}"
    print("KERNEL_OK")
</pallas_src>

<mosaic_0001>
module attributes {stable_mosaic.version = 11 : i64} {
  func.func @gnn_kernel(%arg0: memref<16x8xf32, #tpu.memory_space<vmem>>, %arg1: memref<16x16xf32, #tpu.memory_space<vmem>>, %arg2: memref<16x128xf32, #tpu.memory_space<vmem>>, %arg3: memref<2x16xf32, #tpu.memory_space<vmem>>, %arg4: memref<1520x128xf32, #tpu.memory_space<vmem>>, %arg5: memref<264x256xf32, #tpu.memory_space<vmem>>, %arg6: memref<2x1xf32, #tpu.memory_space<vmem>>) attributes {dimension_semantics = [], scalar_prefetch = 0 : i64, scratch_operands = 0 : i64, tpu.core_type = #tpu.core_type<tc>} {
    %c0 = arith.constant 0 : index
    %c0_0 = arith.constant 0 : index
    %0 = vector.load %arg0[%c0, %c0_0] : memref<16x8xf32, #tpu.memory_space<vmem>>, vector<16x8xf32>
    %c0_1 = arith.constant 0 : index
    %c0_2 = arith.constant 0 : index
    %1 = vector.load %arg1[%c0_1, %c0_2] : memref<16x16xf32, #tpu.memory_space<vmem>>, vector<16x16xf32>
    %c0_3 = arith.constant 0 : index
    %c0_4 = arith.constant 0 : index
    %2 = vector.load %arg2[%c0_3, %c0_4] : memref<16x128xf32, #tpu.memory_space<vmem>>, vector<16x128xf32>
    %3 = vector.shape_cast %2 : vector<16x128xf32> to vector<16x128xf32>
    %c0_5 = arith.constant 0 : index
    %c0_6 = arith.constant 0 : index
    %4 = vector.load %arg3[%c0_5, %c0_6] : memref<2x16xf32, #tpu.memory_space<vmem>>, vector<2x16xf32>
    %c928 = arith.constant 928 : index
    %c0_7 = arith.constant 0 : index
    %5 = vector.load %arg4[%c928, %c0_7] : memref<1520x128xf32, #tpu.memory_space<vmem>>, vector<16x128xf32>
    %c0_8 = arith.constant 0 : index
    %c0_9 = arith.constant 0 : index
    %6 = vector.load %arg4[%c0_8, %c0_9] : memref<1520x128xf32, #tpu.memory_space<vmem>>, vector<8x16xf32>
    %c8 = arith.constant 8 : index
    %c0_10 = arith.constant 0 : index
    %7 = vector.load %arg4[%c8, %c0_10] : memref<1520x128xf32, #tpu.memory_space<vmem>>, vector<1x16xf32>
    %cst = arith.constant dense<0.000000e+00> : vector<16x16xf32>
    %8 = tpu.matmul %0, %6, %cst {dimension_numbers = #tpu.dot_dimension_numbers<[1], [0], [0], [1], [0, 0, 1, 1], [], []>} : vector<16x8xf32>, vector<8x16xf32>, vector<16x16xf32> -> vector<16x16xf32>
    %cst_11 = arith.constant dense<0.000000e+00> : vector<16x16xf32>
    %9 = tpu.matmul %1, %8, %cst_11 {dimension_numbers = #tpu.dot_dimension_numbers<[1], [0], [0], [1], [0, 0, 1, 1], [], []>} : vector<16x16xf32>, vector<16x16xf32>, vector<16x16xf32> -> vector<16x16xf32>
    %10 = vector.broadcast %7 : vector<1x16xf32> to vector<16x16xf32>
    %11 = arith.addf %9, %10 : vector<16x16xf32>
    %cst_12 = arith.constant 0.000000e+00 : f32
    %12 = vector.broadcast %cst_12 : f32 to vector<16x16xf32>
    %13 = arith.maximumf %11, %12 : vector<16x16xf32>
    %c16 = arith.constant 16 : index
    %c0_13 = arith.constant 0 : index
    %14 = vector.load %arg4[%c16, %c0_13] : memref<1520x128xf32, #tpu.memory_space<vmem>>, vector<16x32xf32>
    %c32 = arith.constant 32 : index
    %c0_14 = arith.constant 0 : index
    %15 = vector.load %arg4[%c32, %c0_14] : memref<1520x128xf32, #tpu.memory_space<vmem>>, vector<1x32xf32>
    %cst_15 = arith.constant dense<0.000000e+00> : vector<16x32xf32>
    %16 = tpu.matmul %13, %14, %cst_15 {dimension_numbers = #tpu.dot_dimension_numbers<[1], [0], [0], [1], [0, 0, 1, 1], [], []>} : vector<16x16xf32>, vector<16x32xf32>, vector<16x32xf32> -> vector<16x32xf32>
    %cst_16 = arith.constant dense<0.000000e+00> : vector<16x32xf32>
    %17 = tpu.matmul %1, %16, %cst_16 {dimension_numbers = #tpu.dot_dimension_numbers<[1], [0], [0], [1], [0, 0, 1, 1], [], []>} : vector<16x16xf32>, vector<16x32xf32>, vector<16x32xf32> -> vector<16x32xf32>
    %18 = vector.broadcast %15 : vector<1x32xf32> to vector<16x32xf32>
    %19 = arith.addf %17, %18 : vector<16x32xf32>
    %cst_17 = arith.constant 0.000000e+00 : f32
    %20 = vector.broadcast %cst_17 : f32 to vector<16x32xf32>
    %21 = arith.maximumf %19, %20 : vector<16x32xf32>
    %c40 = arith.constant 40 : index
    %c0_18 = arith.constant 0 : index
    %22 = vector.load %arg4[%c40, %c0_18] : memref<1520x128xf32, #tpu.memory_space<vmem>>, vector<32x128xf32>
    %c72 = arith.constant 72 : index
    %c0_19 = arith.constant 0 : index
    %23 = vector.load %arg4[%c72, %c0_19] : memref<1520x128xf32, #tpu.memory_space<vmem>>, vector<128x8xf32>
    %c200 = arith.constant 200 : index
    %c0_20 = arith.constant 0 : index
    %24 = vector.load %arg4[%c200, %c0_20] : memref<1520x128xf32, #tpu.memory_space<vmem>>, vector<1x128xf32>
    %c208 = arith.constant 208 : index
    %c0_21 = arith.constant 0 : index
    %25 = vector.load %arg4[%c208, %c0_21] : memref<1520x128xf32, #tpu.memory_space<vmem>>, vector<4x64xf32>
    %c216 = arith.constant 216 : index
    %c0_22 = arith.constant 0 : index
    %26 = vector.load %arg4[%c216, %c0_22] : memref<1520x128xf32, #tpu.memory_space<vmem>>, vector<64x4xf32>
    %c280 = arith.constant 280 : index
    %c0_23 = arith.constant 0 : index
    %27 = vector.load %arg4[%c280, %c0_23] : memref<1520x128xf32, #tpu.memory_space<vmem>>, vector<64x16xf32>
    %c344 = arith.constant 344 : index
    %c0_24 = arith.constant 0 : index
    %28 = vector.load %arg4[%c344, %c0_24] : memref<1520x128xf32, #tpu.memory_space<vmem>>, vector<64x128xf32>
    %29 = vector.extract_strided_slice %3 {offsets = [0, 0], sizes = [16, 64], strides = [1, 1]} : vector<16x128xf32> to vector<16x64xf32>
    %cst_25 = arith.constant dense<0.000000e+00> : vector<16x128xf32>
    %30 = tpu.matmul %21, %22, %cst_25 {dimension_numbers = #tpu.dot_dimension_numbers<[1], [0], [0], [1], [0, 0, 1, 1], [], []>} : vector<16x32xf32>, vector<32x128xf32>, vector<16x128xf32> -> vector<16x128xf32>
    %cst_26 = arith.constant dense<0.000000e+00> : vector<16x8xf32>
    %31 = tpu.matmul %30, %23, %cst_26 {dimension_numbers = #tpu.dot_dimension_numbers<[1], [0], [0], [1], [0, 0, 1, 1], [], []>} : vector<16x128xf32>, vector<128x8xf32>, vector<16x8xf32> -> vector<16x8xf32>
    %32 = vector.extract_strided_slice %31 {offsets = [0, 0], sizes = [16, 4], strides = [1, 1]} : vector<16x8xf32> to vector<16x4xf32>
    %33 = vector.extract_strided_slice %31 {offsets = [0, 4], sizes = [16, 4], strides = [1, 1]} : vector<16x8xf32> to vector<16x4xf32>
    %cst_27 = arith.constant dense<0.000000e+00> : vector<16x64xf32>
    %34 = tpu.matmul %32, %25, %cst_27 {dimension_numbers = #tpu.dot_dimension_numbers<[1], [0], [0], [1], [0, 0, 1, 1], [], []>} : vector<16x4xf32>, vector<4x64xf32>, vector<16x64xf32> -> vector<16x64xf32>
    %cst_28 = arith.constant dense<0.000000e+00> : vector<16x64xf32>
    %35 = tpu.matmul %33, %25, %cst_28 {dimension_numbers = #tpu.dot_dimension_numbers<[1], [0], [0], [1], [0, 0, 1, 1], [], []>} : vector<16x4xf32>, vector<4x64xf32>, vector<16x64xf32> -> vector<16x64xf32>
    %36 = vector.extract_strided_slice %5 {offsets = [0, 0], sizes = [16, 64], strides = [1, 1]} : vector<16x128xf32> to vector<16x64xf32>
    %37 = arith.mulf %35, %36 : vector<16x64xf32>
    %cst_29 = arith.constant dense<0.000000e+00> : vector<64xf32>
    %38 = vector.multi_reduction <add>, %37, %cst_29 [0] : vector<16x64xf32> to vector<64xf32>
    %39 = vector.shape_cast %38 : vector<64xf32> to vector<1x64xf32>
    %40 = vector.broadcast %39 : vector<1x64xf32> to vector<16x64xf32>
    %41 = arith.addf %34, %40 : vector<16x64xf32>
    %cst_30 = arith.constant 0.000000e+00 : f32
    %42 = vector.broadcast %cst_30 : f32 to vector<16x64xf32>
    %43 = arith.cmpf oge, %41, %42 : vector<16x64xf32>
    %cst_31 = arith.constant 2.000000e-01 : f32
    %44 = vector.broadcast %cst_31 : f32 to vector<16x64xf32>
    %45 = arith.mulf %44, %41 : vector<16x64xf32>
    %46 = arith.select %43, %41, %45 : vector<16x64xi1>, vector<16x64xf32>
    %47 = arith.addf %46, %29 : vector<16x64xf32>
    %cst_32 = arith.constant dense<0xFF800000> : vector<16xf32>
    %48 = vector.multi_reduction <maximumf>, %47, %cst_32 [1] : vector<16x64xf32> to vector<16xf32>
    %49 = vector.shape_cast %48 : vector<16xf32> to vector<16x1xf32>
    %50 = vector.broadcast %49 : vector<16x1xf32> to vector<16x64xf32>
    %51 = arith.subf %47, %50 : vector<16x64xf32>
    %52 = math.exp %51 : vector<16x64xf32>
    %cst_33 = arith.constant dense<0.000000e+00> : vector<16x4xf32>
    %53 = tpu.matmul %52, %26, %cst_33 {dimension_numbers = #tpu.dot_dimension_numbers<[1], [0], [0], [1], [0, 0, 1, 1], [], []>} : vector<16x64xf32>, vector<64x4xf32>, vector<16x4xf32> -> vector<16x4xf32>
    %cst_34 = arith.constant 1.000000e-30 : f32
    %54 = vector.broadcast %cst_34 : f32 to vector<16x4xf32>
    %55 = arith.maximumf %53, %54 : vector<16x4xf32>
    %56 = tpu.reciprocal %55 {approx = true} : vector<16x4xf32> -> vector<16x4xf32>
    %57 = arith.mulf %55, %56 : vector<16x4xf32>
    %cst_35 = arith.constant 2.000000e+00 : f32
    %58 = vector.broadcast %cst_35 : f32 to vector<16x4xf32>
    %59 = arith.subf %58, %57 : vector<16x4xf32>
    %60 = arith.mulf %56, %59 : vector<16x4xf32>
    %cst_36 = arith.constant dense<0.000000e+00> : vector<16x64xf32>
    %61 = tpu.matmul %60, %25, %cst_36 {dimension_numbers = #tpu.dot_dimension_numbers<[1], [0], [0], [1], [0, 0, 1, 1], [], []>} : vector<16x4xf32>, vector<4x64xf32>, vector<16x64xf32> -> vector<16x64xf32>
    %62 = arith.mulf %52, %61 : vector<16x64xf32>
    %cst_37 = arith.constant dense<0.000000e+00> : vector<64x128xf32>
    %63 = tpu.matmul %27, %30, %cst_37 {dimension_numbers = #tpu.dot_dimension_numbers<[1], [0], [0], [1], [0, 0, 1, 1], [], []>} : vector<64x16xf32>, vector<16x128xf32>, vector<64x128xf32> -> vector<64x128xf32>
    %64 = arith.mulf %63, %28 : vector<64x128xf32>
    %cst_38 = arith.constant dense<0.000000e+00> : vector<16x128xf32>
    %65 = tpu.matmul %62, %64, %cst_38 {dimension_numbers = #tpu.dot_dimension_numbers<[1], [0], [0], [1], [0, 0, 1, 1], [], []>} : vector<16x64xf32>, vector<64x128xf32>, vector<16x128xf32> -> vector<16x128xf32>
    %66 = vector.broadcast %24 : vector<1x128xf32> to vector<16x128xf32>
    %67 = arith.addf %65, %66 : vector<16x128xf32>
    %cst_39 = arith.constant 0.000000e+00 : f32
    %68 = vector.broadcast %cst_39 : f32 to vector<16x128xf32>
    %69 = arith.maximumf %67, %68 : vector<16x128xf32>
    %c0_40 = arith.constant 0 : index
    %c0_41 = arith.constant 0 : index
    %70 = vector.load %arg5[%c0_40, %c0_41] : memref<264x256xf32, #tpu.memory_space<vmem>>, vector<128x256xf32>
    %c408 = arith.constant 408 : index
    %c0_42 = arith.constant 0 : index
    %71 = vector.load %arg4[%c408, %c0_42] : memref<1520x128xf32, #tpu.memory_space<vmem>>, vector<256x16xf32>
    %c128 = arith.constant 128 : index
    %c0_43 = arith.constant 0 : index
    %72 = vector.load %arg5[%c128, %c0_43] : memref<264x256xf32, #tpu.memory_space<vmem>>, vector<1x256xf32>
    %c664 = arith.constant 664 : index
    %c0_44 = arith.constant 0 : index
    %73 = vector.load %arg4[%c664, %c0_44] : memref<1520x128xf32, #tpu.memory_space<vmem>>, vector<8x128xf32>
    %c672 = arith.constant 672 : index
    %c0_45 = arith.constant 0 : index
    %74 = vector.load %arg4[%c672, %c0_45] : memref<1520x128xf32, #tpu.memory_space<vmem>>, vector<128x8xf32>
    %c800 = arith.constant 800 : index
    %c0_46 = arith.constant 0 : index
    %75 = vector.load %arg4[%c800, %c0_46] : memref<1520x128xf32, #tpu.memory_space<vmem>>, vector<128x16xf32>
    %c136 = arith.constant 136 : index
    %c0_47 = arith.constant 0 : index
    %76 = vector.load %arg5[%c136, %c0_47] : memref<264x256xf32, #tpu.memory_space<vmem>>, vector<128x256xf32>
    %cst_48 = arith.constant dense<0.000000e+00> : vector<16x256xf32>
    %77 = tpu.matmul %69, %70, %cst_48 {dimension_numbers = #tpu.dot_dimension_numbers<[1], [0], [0], [1], [0, 0, 1, 1], [], []>} : vector<16x128xf32>, vector<128x256xf32>, vector<16x256xf32> -> vector<16x256xf32>
    %cst_49 = arith.constant dense<0.000000e+00> : vector<16x16xf32>
    %78 = tpu.matmul %77, %71, %cst_49 {dimension_numbers = #tpu.dot_dimension_numbers<[1], [0], [0], [1], [0, 0, 1, 1], [], []>} : vector<16x256xf32>, vector<256x16xf32>, vector<16x16xf32> -> vector<16x16xf32>
    %79 = vector.extract_strided_slice %78 {offsets = [0, 0], sizes = [16, 8], strides = [1, 1]} : vector<16x16xf32> to vector<16x8xf32>
    %80 = vector.extract_strided_slice %78 {offsets = [0, 8], sizes = [16, 8], strides = [1, 1]} : vector<16x16xf32> to vector<16x8xf32>
    %cst_50 = arith.constant dense<0.000000e+00> : vector<16x128xf32>
    %81 = tpu.matmul %79, %73, %cst_50 {dimension_numbers = #tpu.dot_dimension_numbers<[1], [0], [0], [1], [0, 0, 1, 1], [], []>} : vector<16x8xf32>, vector<8x128xf32>, vector<16x128xf32> -> vector<16x128xf32>
    %cst_51 = arith.constant dense<0.000000e+00> : vector<16x128xf32>
    %82 = tpu.matmul %80, %73, %cst_51 {dimension_numbers = #tpu.dot_dimension_numbers<[1], [0], [0], [1], [0, 0, 1, 1], [], []>} : vector<16x8xf32>, vector<8x128xf32>, vector<16x128xf32> -> vector<16x128xf32>
    %83 = arith.mulf %82, %5 : vector<16x128xf32>
    %cst_52 = arith.constant dense<0.000000e+00> : vector<128xf32>
    %84 = vector.multi_reduction <add>, %83, %cst_52 [0] : vector<16x128xf32> to vector<128xf32>
    %85 = vector.shape_cast %84 : vector<128xf32> to vector<1x128xf32>
    %86 = vector.broadcast %85 : vector<1x128xf32> to vector<16x128xf32>
    %87 = arith.addf %81, %86 : vector<16x128xf32>
    %cst_53 = arith.constant 0.000000e+00 : f32
    %88 = vector.broadcast %cst_53 : f32 to vector<16x128xf32>
    %89 = arith.cmpf oge, %87, %88 : vector<16x128xf32>
    %cst_54 = arith.constant 2.000000e-01 : f32
    %90 = vector.broadcast %cst_54 : f32 to vector<16x128xf32>
    %91 = arith.mulf %90, %87 : vector<16x128xf32>
    %92 = arith.select %89, %87, %91 : vector<16x128xi1>, vector<16x128xf32>
    %93 = arith.addf %92, %3 : vector<16x128xf32>
    %cst_55 = arith.constant dense<0xFF800000> : vector<16xf32>
    %94 = vector.multi_reduction <maximumf>, %93, %cst_55 [1] : vector<16x128xf32> to vector<16xf32>
    %95 = vector.shape_cast %94 : vector<16xf32> to vector<16x1xf32>
    %96 = vector.broadcast %95 : vector<16x1xf32> to vector<16x128xf32>
    %97 = arith.subf %93, %96 : vector<16x128xf32>
    %98 = math.exp %97 : vector<16x128xf32>
    %cst_56 = arith.constant dense<0.000000e+00> : vector<16x8xf32>
    %99 = tpu.matmul %98, %74, %cst_56 {dimension_numbers = #tpu.dot_dimension_numbers<[1], [0], [0], [1], [0, 0, 1, 1], [], []>} : vector<16x128xf32>, vector<128x8xf32>, vector<16x8xf32> -> vector<16x8xf32>
    %cst_57 = arith.constant 1.000000e-30 : f32
    %100 = vector.broadcast %cst_57 : f32 to vector<16x8xf32>
    %101 = arith.maximumf %99, %100 : vector<16x8xf32>
    %102 = tpu.reciprocal %101 {approx = true} : vector<16x8xf32> -> vector<16x8xf32>
    %103 = arith.mulf %101, %102 : vector<16x8xf32>
    %cst_58 = arith.constant 2.000000e+00 : f32
    %104 = vector.broadcast %cst_58 : f32 to vector<16x8xf32>
    %105 = arith.subf %104, %103 : vector<16x8xf32>
    %106 = arith.mulf %102, %105 : vector<16x8xf32>
    %cst_59 = arith.constant dense<0.000000e+00> : vector<16x128xf32>
    %107 = tpu.matmul %106, %73, %cst_59 {dimension_numbers = #tpu.dot_dimension_numbers<[1], [0], [0], [1], [0, 0, 1, 1], [], []>} : vector<16x8xf32>, vector<8x128xf32>, vector<16x128xf32> -> vector<16x128xf32>
    %108 = arith.mulf %98, %107 : vector<16x128xf32>
    %cst_60 = arith.constant dense<0.000000e+00> : vector<128x256xf32>
    %109 = tpu.matmul %75, %77, %cst_60 {dimension_numbers = #tpu.dot_dimension_numbers<[1], [0], [0], [1], [0, 0, 1, 1], [], []>} : vector<128x16xf32>, vector<16x256xf32>, vector<128x256xf32> -> vector<128x256xf32>
    %110 = arith.mulf %109, %76 : vector<128x256xf32>
    %cst_61 = arith.constant dense<0.000000e+00> : vector<16x256xf32>
    %111 = tpu.matmul %108, %110, %cst_61 {dimension_numbers = #tpu.dot_dimension_numbers<[1], [0], [0], [1], [0, 0, 1, 1], [], []>} : vector<16x128xf32>, vector<128x256xf32>, vector<16x256xf32> -> vector<16x256xf32>
    %112 = vector.broadcast %72 : vector<1x256xf32> to vector<16x256xf32>
    %113 = arith.addf %111, %112 : vector<16x256xf32>
    %cst_62 = arith.constant 0.000000e+00 : f32
    %114 = vector.broadcast %cst_62 : f32 to vector<16x256xf32>
    %115 = arith.maximumf %113, %114 : vector<16x256xf32>
    %c944 = arith.constant 944 : index
    %c0_63 = arith.constant 0 : index
    %116 = vector.load %arg4[%c944, %c0_63] : memref<1520x128xf32, #tpu.memory_space<vmem>>, vector<16x128xf32>
    %cst_64 = arith.constant dense<0.000000e+00> : vector<16x128xf32>
    %117 = tpu.matmul %13, %116, %cst_64 {dimension_numbers = #tpu.dot_dimension_numbers<[1], [0], [0], [1], [0, 0, 1, 1], [], []>} : vector<16x16xf32>, vector<16x128xf32>, vector<16x128xf32> -> vector<16x128xf32>
    %c960 = arith.constant 960 : index
    %c0_65 = arith.constant 0 : index
    %118 = vector.load %arg4[%c960, %c0_65] : memref<1520x128xf32, #tpu.memory_space<vmem>>, vector<32x128xf32>
    %cst_66 = arith.constant dense<0.000000e+00> : vector<16x128xf32>
    %119 = tpu.matmul %21, %118, %cst_66 {dimension_numbers = #tpu.dot_dimension_numbers<[1], [0], [0], [1], [0, 0, 1, 1], [], []>} : vector<16x32xf32>, vector<32x128xf32>, vector<16x128xf32> -> vector<16x128xf32>
    %120 = arith.addf %117, %119 : vector<16x128xf32>
    %c992 = arith.constant 992 : index
    %c0_67 = arith.constant 0 : index
    %121 = vector.load %arg4[%c992, %c0_67] : memref<1520x128xf32, #tpu.memory_space<vmem>>, vector<128x128xf32>
    %cst_68 = arith.constant dense<0.000000e+00> : vector<16x128xf32>
    %122 = tpu.matmul %69, %121, %cst_68 {dimension_numbers = #tpu.dot_dimension_numbers<[1], [0], [0], [1], [0, 0, 1, 1], [], []>} : vector<16x128xf32>, vector<128x128xf32>, vector<16x128xf32> -> vector<16x128xf32>
    %123 = arith.addf %120, %122 : vector<16x128xf32>
    %c1120 = arith.constant 1120 : index
    %c0_69 = arith.constant 0 : index
    %124 = vector.load %arg4[%c1120, %c0_69] : memref<1520x128xf32, #tpu.memory_space<vmem>>, vector<256x128xf32>
    %cst_70 = arith.constant dense<0.000000e+00> : vector<16x128xf32>
    %125 = tpu.matmul %115, %124, %cst_70 {dimension_numbers = #tpu.dot_dimension_numbers<[1], [0], [0], [1], [0, 0, 1, 1], [], []>} : vector<16x256xf32>, vector<256x128xf32>, vector<16x128xf32> -> vector<16x128xf32>
    %126 = arith.addf %123, %125 : vector<16x128xf32>
    %cst_71 = arith.constant dense<0.000000e+00> : vector<2x128xf32>
    %127 = tpu.matmul %4, %126, %cst_71 {dimension_numbers = #tpu.dot_dimension_numbers<[1], [0], [0], [1], [0, 0, 1, 1], [], []>} : vector<2x16xf32>, vector<16x128xf32>, vector<2x128xf32> -> vector<2x128xf32>
    %c1376 = arith.constant 1376 : index
    %c0_72 = arith.constant 0 : index
    %128 = vector.load %arg4[%c1376, %c0_72] : memref<1520x128xf32, #tpu.memory_space<vmem>>, vector<1x128xf32>
    %129 = vector.broadcast %128 : vector<1x128xf32> to vector<2x128xf32>
    %130 = arith.addf %127, %129 : vector<2x128xf32>
    %cst_73 = arith.constant 0.000000e+00 : f32
    %131 = vector.broadcast %cst_73 : f32 to vector<2x128xf32>
    %132 = arith.maximumf %130, %131 : vector<2x128xf32>
    %c1384 = arith.constant 1384 : index
    %c0_74 = arith.constant 0 : index
    %133 = vector.load %arg4[%c1384, %c0_74] : memref<1520x128xf32, #tpu.memory_space<vmem>>, vector<128x1xf32>
    %cst_75 = arith.constant dense<0.000000e+00> : vector<2x1xf32>
    %134 = tpu.matmul %132, %133, %cst_75 {dimension_numbers = #tpu.dot_dimension_numbers<[1], [0], [0], [1], [0, 0, 1, 1], [], []>} : vector<2x128xf32>, vector<128x1xf32>, vector<2x1xf32> -> vector<2x1xf32>
    %c1512 = arith.constant 1512 : index
    %c0_76 = arith.constant 0 : index
    %135 = vector.load %arg4[%c1512, %c0_76] : memref<1520x128xf32, #tpu.memory_space<vmem>>, vector<1x1xf32>
    %136 = vector.broadcast %135 : vector<1x1xf32> to vector<2x1xf32>
    %137 = arith.addf %134, %136 : vector<2x1xf32>
    %c0_77 = arith.constant 0 : index
    %c0_78 = arith.constant 0 : index
    %138 = vector.load %arg6[%c0_77, %c0_78] : memref<2x1xf32, #tpu.memory_space<vmem>>, vector<2x1xf32>
    tpu.vector_store %arg6[%c0_77, %c0_78], %137 {strides = array<i32>} : memref<2x1xf32, #tpu.memory_space<vmem>>, vector<2x1xf32>,
    return
  }
}

</mosaic_0001>

<bundles_post_ra>
// kernel: tile.9
= control target key start
LH: loop header
LB: loop body
LE: loop exit
PB: predicated region body
PF: predicated region fallthrough
CT: control target
= control target key end

     0   :  { %vm4_vm0 = vcmask 1047556   ;;  %s209_s14 = smov 96   ;;  %s210_s19 = smov 112   ;;  %vm6_vm1 = vcmask 130048   ;;  %vm25_vm2 = vcmask 1048448   ;;  %vm46_vm3 = vcmask 917248   ;;  %s388_s0 = inlined_call_operand.vmem [shape: f32[16,8,16], index: 0, kind: input, shape index: {}]   ;;  %s389_s1 = inlined_call_operand.vmem [shape: f32[16,128], index: 1, kind: output, shape index: {}]  }
   0x1   :  { %v172_v0 = vld [vmem:[%s388_s0 + $0x6] ss:$8 sm:$0xf]   ;;  %v167_v3 = vld [vmem:[%s388_s0 + $0x7] ss:$8 sm:$0xf]  }
   0x2   :  { %v173_v1 = vld [vmem:[%s388_s0 + $0x6] ss:$8 sm:$0xf0]   ;;  %v168_v4 = vld [vmem:[%s388_s0 + $0x7] ss:$8 sm:$0xf0]  }
   0x3   :  { %v43_v2 = vsel %vm4_vm0, %v173_v1, %v172_v0  ;;  %v22_v5 = vsel %vm4_vm0, %v168_v4, %v167_v3  ;;  %v174_v6 = vld [vmem:[%s388_s0 + $0x46] ss:$8 sm:$0xf]   ;;  %v169_v9 = vld [vmem:[%s388_s0 + $0x47] ss:$8 sm:$0xf]  }
   0x4   :  { %44 = vrot.lane.b32.xlu1 %v43_v2, %s209_s14  ;;  %v175_v7 = vld [vmem:[%s388_s0 + $0x46] ss:$8 sm:$0xf0]   ;;  %23 = vrot.lane.b32.xlu0 %v22_v5, %s210_s19  ;;  %v170_v10 = vld [vmem:[%s388_s0 + $0x47] ss:$8 sm:$0xf0]  }
   0x5   :  { %v53_v8 = vsel %vm4_vm0, %v175_v7, %v174_v6  ;;  %v32_v11 = vsel %vm4_vm0, %v170_v10, %v169_v9  ;;  %v179_v12 = vld [vmem:[%s388_s0 + $0x45] ss:$8 sm:$0xf]   ;;  %v184_v18 = vld [vmem:[%s388_s0 + $0x44] ss:$8 sm:$0xf]  }
   0x6   :  { %v180_v13 = vld [vmem:[%s388_s0 + $0x45] ss:$8 sm:$0xf0]   ;;  %v185_v19 = vld [vmem:[%s388_s0 + $0x44] ss:$8 sm:$0xf0]  }
   0x7   :  { %v177_v14 = vld [vmem:[%s388_s0 + $0x5] ss:$8 sm:$0xf]   ;;  %v74_v16 = vsel %vm4_vm0, %v180_v13, %v179_v12  ;;  %v182_v20 = vld [vmem:[%s388_s0 + $0x4] ss:$8 sm:$0xf]   ;;  %v95_v22 = vsel %vm4_vm0, %v185_v19, %v184_v18 }
   0x8   :  { %54 = vrot.lane.b32.xlu1 %v53_v8, %s209_s14  ;;  %v178_v15 = vld [vmem:[%s388_s0 + $0x5] ss:$8 sm:$0xf0]   ;;  %33 = vrot.lane.b32.xlu0 %v32_v11, %s210_s19  ;;  %v183_v21 = vld [vmem:[%s388_s0 + $0x4] ss:$8 sm:$0xf0]  }
   0x9   :  { %v64_v17 = vsel %vm4_vm0, %v178_v15, %v177_v14  ;;  %s211_s11 = smov 80   ;;  %v85_v23 = vsel %vm4_vm0, %v183_v21, %v182_v20  ;;  %v189_v24 = vld [vmem:[%s388_s0 + $0x43] ss:$8 sm:$0xf]   ;;  %s212_s20 = smov 64   ;;  %vm67_vm4 = vcmask 786048  }
   0xa   :  { %v190_v25 = vld [vmem:[%s388_s0 + $0x43] ss:$8 sm:$0xf0]   ;;  %v194_v28 = vld [vmem:[%s388_s0 + $0x42] ss:$8 sm:$0xf]  }
   0xb   :  { %v187_v26 = vld [vmem:[%s388_s0 + $0x3] ss:$8 sm:$0xf]   ;;  %v195_v29 = vld [vmem:[%s388_s0 + $0x42] ss:$8 sm:$0xf0]   ;;  %v116_v30 = vsel %vm4_vm0, %v190_v25, %v189_v24 }
   0xc   :  { %75 = vrot.lane.b32.xlu1 %v74_v16, %s211_s11  ;;  %65 = vrot.lane.b32.xlu0 %v64_v17, %s211_s11  ;;  %v188_v27 = vld [vmem:[%s388_s0 + $0x3] ss:$8 sm:$0xf0]   ;;  %v192_v31 = vld [vmem:[%s388_s0 + $0x2] ss:$8 sm:$0xf]   ;;  %v137_v40 = vsel %vm4_vm0, %v195_v29, %v194_v28 }
   0xd   :  { %v2_v32 = vld [vmem:[%s388_s0] ss:$8 sm:$0xf]   ;;  %v106_v33 = vsel %vm4_vm0, %v188_v27, %v187_v26  ;;  %v193_v36 = vld [vmem:[%s388_s0 + $0x2] ss:$8 sm:$0xf0]  }
   0xe   :  { %v3_v34 = vld [vmem:[%s388_s0] ss:$8 sm:$0xf0]   ;;  %s213_s8 = smov 48   ;;  %v127_v41 = vsel %vm4_vm0, %v193_v36, %v192_v31  ;;  %s215_s21 = smov 16   ;;  %vm88_vm5 = vcmask 654848  }
   0xf   :  { %v164_v35 = vld [vmem:[%s388_s0 + $0x40] ss:$8 sm:$0xf]   ;;  %v5_v37 = vsel %vm4_vm0, %v3_v34, %v2_v32  ;;  %v199_v42 = vld [vmem:[%s388_s0 + $0x41] ss:$8 sm:$0xf]  }
  0x10   :  { %96 = vrot.lane.b32.xlu1 %v95_v22, %s212_s20  ;;  %86 = vrot.lane.b32.xlu0 %v85_v23, %s212_s20  ;;  %v165_v38 = vld [vmem:[%s388_s0 + $0x40] ss:$8 sm:$0xf0]   ;;  %7 = vst.msk [vmem:[%s389_s1] sm:$0xff] %vm6_vm1, %v5_v37   ;;  %vm109_vm6 = vcmask 523648   ;;  %vm130_vm7 = vcmask 392448  }
  0x11   :  { %v13_v39 = vsel %vm4_vm0, %v165_v38, %v164_v35  ;;  %v200_v43 = vld [vmem:[%s388_s0 + $0x41] ss:$8 sm:$0xf0]   ;;  %vm151_vm8 = vcmask 261248  }
  0x12   :  { %166 = vst.msk [vmem:[%s389_s1 + $0x8] sm:$0xff] %vm6_vm1, %v13_v39   ;;  %v197_v44 = vld [vmem:[%s388_s0 + $0x1] ss:$8 sm:$0xf]   ;;  %v158_v46 = vsel %vm4_vm0, %v200_v43, %v199_v42 }
  0x13   :  { %v198_v45 = vld [vmem:[%s388_s0 + $0x1] ss:$8 sm:$0xf0]   ;;  %s214_s0 = smov 32  }
  0x14   :  { %117 = vrot.lane.b32.xlu1 %v116_v30, %s213_s8  ;;  %107 = vrot.lane.b32.xlu0 %v106_v33, %s213_s8  ;;  %v148_v47 = vsel %vm4_vm0, %v198_v45, %v197_v44 }
  0x18   :  { %138 = vrot.lane.b32.xlu1 %v137_v40, %s214_s0  ;;  %128 = vrot.lane.b32.xlu0 %v127_v41, %s214_s0 }
  0x1c   :  { %159 = vrot.lane.b32.xlu1 %v158_v46, %s215_s21  ;;  %149 = vrot.lane.b32.xlu0 %v148_v47, %s215_s21 }
  0x76   :  { %v45_v48 = vpop.permute.xlu1 %44   ;;  %v24_v49 = vpop.permute.xlu0 %23  }
  0x77   :  { %26 = vst.msk [vmem:[%s389_s1] sm:$0xff] %vm25_vm2, %v24_v49  }
  0x78   :  { %47 = vst.msk [vmem:[%s389_s1] sm:$0xff] %vm46_vm3, %v45_v48  }
  0x7a   :  { %v55_v50 = vpop.permute.xlu1 %54   ;;  %v34_v51 = vpop.permute.xlu0 %33  }
  0x7b   :  { %171 = vst.msk [vmem:[%s389_s1 + $0x8] sm:$0xff] %vm25_vm2, %v34_v51  }
  0x7c   :  { %176 = vst.msk [vmem:[%s389_s1 + $0x8] sm:$0xff] %vm46_vm3, %v55_v50  }
  0x7e   :  { %v76_v52 = vpop.permute.xlu1 %75   ;;  %v66_v53 = vpop.permute.xlu0 %65  }
  0x7f   :  { %181 = vst.msk [vmem:[%s389_s1 + $0x8] sm:$0xff] %vm67_vm4, %v76_v52   ;;  %68 = vst.msk [vmem:[%s389_s1] sm:$0xff] %vm67_vm4, %v66_v53  }
  0x82   :  { %v97_v54 = vpop.permute.xlu1 %96   ;;  %v87_v55 = vpop.permute.xlu0 %86  }
  0x83   :  { %186 = vst.msk [vmem:[%s389_s1 + $0x8] sm:$0xff] %vm88_vm5, %v97_v54   ;;  %89 = vst.msk [vmem:[%s389_s1] sm:$0xff] %vm88_vm5, %v87_v55  }
  0x86   :  { %v118_v56 = vpop.permute.xlu1 %117   ;;  %v108_v57 = vpop.permute.xlu0 %107  }
  0x87   :  { %191 = vst.msk [vmem:[%s389_s1 + $0x8] sm:$0xff] %vm109_vm6, %v118_v56   ;;  %110 = vst.msk [vmem:[%s389_s1] sm:$0xff] %vm109_vm6, %v108_v57  }
  0x8a   :  { %v139_v58 = vpop.permute.xlu1 %138   ;;  %v129_v59 = vpop.permute.xlu0 %128  }
  0x8b   :  { %196 = vst.msk [vmem:[%s389_s1 + $0x8] sm:$0xff] %vm130_vm7, %v139_v58   ;;  %131 = vst.msk [vmem:[%s389_s1] sm:$0xff] %vm130_vm7, %v129_v59  }
  0x8e   :  { %v160_v60 = vpop.permute.xlu1 %159   ;;  %v150_v61 = vpop.permute.xlu0 %149  }
  0x8f   :  { %201 = vst.msk [vmem:[%s389_s1 + $0x8] sm:$0xff] %vm151_vm8, %v160_v60   ;;  %152 = vst.msk [vmem:[%s389_s1] sm:$0xff] %vm151_vm8, %v150_v61  }

// kernel: deeper_enhanced_gcn_forward.1
= control target key start
LH: loop header
LB: loop body
LE: loop exit
PB: predicated region body
PF: predicated region fallthrough
CT: control target
= control target key end

     0   :  { %11 = vsyncpa [#allocation3], 0  ;;  %s4043_s0 = inlined_call_operand.vmem [shape: f32[16,8], index: 0, kind: input, shape index: {}]   ;;  %s4044_s1 = inlined_call_operand.vmem [shape: f32[16,16], index: 1, kind: input, shape index: {}]   ;;  %s4045_s2 = inlined_call_operand.vmem [shape: f32[16,128], index: 2, kind: input, shape index: {}]   ;;  %s4046_s3 = inlined_call_operand.vmem [shape: f32[2,16], index: 3, kind: input, shape index: {}]   ;;  %s4047_s4 = inlined_call_operand.hbm [shape: f32[1520,128], index: 4, kind: input, shape index: {}]   ;;  %s4048_s5 = inlined_call_operand.hbm [shape: f32[264,256], index: 5, kind: input, shape index: {}]   ;;  %s4049_s6 = inlined_call_operand.vmem [shape: f32[2,1], index: 6, kind: output, shape index: {}]  }
   0x1   :  { %12 = vsyncpa [#allocation5], 0  ;;  %s3692_s21 = smov [#allocation2]   ;;  %s3644_s25 = scalar_lea.hbm %s4047_s4, 24320 }
   0x2   :  { %s26_s22 = sshll.u32 %s3692_s21, 4  ;;  %p3645_p0 = scmp.ne.s32.totalorder %s4047_s4, %s3644_s25  ;;  %s27_s22 = int_to_ptr.vmem [resolvable:$true] %s26_s22 }
   0x3   :  { %p3648_p1 = scmp.lt.u32.totalorder %s3644_s25, %s4047_s4 }
   0x5   :  { %p3650_p2 = pnand %p3648_p1, %p3645_p0 }
   0x7   :  { %3653 = shalt.err (!%p3650_p2)
}
   0x8   :  { %s3654_s30 = scalar_lea.vmem %s27_s22, 24320  ;;  %p3659_p4 = scmp.lt.s32.totalorder %s27_s22, %s27_s22 }
   0x9   :  { %p3655_p3 = scmp.ne.s32.totalorder %s27_s22, %s3654_s30  ;;  %p3660_p5 = scmp.lt.s32.totalorder %s3654_s30, %s3654_s30 }
   0xb   :  { %p3661_p6 = por %p3660_p5, %p3659_p4 }
   0xd   :  { %p3662_p7 = pnand %p3661_p6, %p3655_p3 }
   0xf   :  { %3665 = shalt.err (!%p3662_p7)
}
  0x10   :  { %s3693_s7 = smov 128   ;;  %s3694_s8 = smov 8  }
  0x11   :  { %32 = dma.hbm_to_vmem [thread:$0]  %s4047_s4, 24320, %s27_s22, [#allocation3], %s3693_s7, %s3693_s7, %s3694_s8  }
  0x12   :  { %s3695_s11 = smov [#allocation4]   ;;  %s3666_s15 = scalar_lea.hbm %s4048_s5, 8448 }
  0x13   :  { %s38_s12 = sshll.u32 %s3695_s11, 4  ;;  %p3667_p8 = scmp.ne.s32.totalorder %s4048_s5, %s3666_s15  ;;  %s39_s12 = int_to_ptr.vmem [resolvable:$true] %s38_s12 }
  0x14   :  { %p3670_p9 = scmp.lt.u32.totalorder %s3666_s15, %s4048_s5 }
  0x16   :  { %p3672_p10 = pnand %p3670_p9, %p3667_p8 }
  0x18   :  { %3675 = shalt.err (!%p3672_p10)
}
  0x19   :  { %s3676_s20 = scalar_lea.vmem %s39_s12, 8448  ;;  %p3681_p12 = scmp.lt.s32.totalorder %s39_s12, %s39_s12 }
  0x1a   :  { %p3677_p11 = scmp.ne.s32.totalorder %s39_s12, %s3676_s20  ;;  %p3682_p13 = scmp.lt.s32.totalorder %s3676_s20, %s3676_s20 }
  0x1c   :  { %p3683_p0 = por %p3682_p13, %p3681_p12 }
  0x1e   :  { %p3684_p1 = pnand %p3683_p0, %p3677_p11 }
  0x20   :  { %3687 = shalt.err (!%p3684_p1)
}
  0x21   :  { %s3696_s4 = smov 256   ;;  %s3697_s21 = smov 16  }
  0x22   :  { %44 = dma.hbm_to_vmem [thread:$0]  %s4048_s5, 8448, %s39_s12, [#allocation5], %s3696_s4, %s3696_s4, %s3697_s21  }
  0x23   :  { %3688 = dma.done.wait [#allocation3], 24320  }
  0x24   :  { %3689 = vsyncadd [#allocation3], 4294942976 }
  0x25   :  { %3690 = dma.done.wait [#allocation5], 8448  }
  0x26   :  { %3691 = vsyncadd [#allocation5], 4294958848  ;;  %vm62_vm0 = vcmask 64512   ;;  %v60_v0 = vld [vmem:[#allocation2] sm:$0xff]  ;;  %v52_v2 = vld [vmem:[%s4043_s0 + $0x8] sm:$0xff]  ;;  %vm148_vm1 = vcmask 130048  }
  0x27   :  { %v51_v1 = vld [vmem:[%s4043_s0] sm:$0xff]  ;;  %3002 = vmatprep.subr.mxu0 %v60_v0  ;;  %v54_v7 = vld [vmem:[%s4044_s1 + $0x8] sm:$0xff]  ;;  %v232_v8 = vld [vmem:[#allocation2 + $0x10] sm:$0xff]  ;;  %vm443_vm2 = vcmask 261120   ;;  %vm611_vm3 = vcmask 1043456   ;;  %vm606_vm4 = vcmask 31744  }
  0x28   :  { %3004 = vmatprep.mubr.msk.f32.mxu0 %vm62_vm0, %v51_v1  ;;  %3003 = vmatpush3.msra.mxu0 %v60_v0  ;;  %v53_v3 = vld [vmem:[%s4044_s1] sm:$0xff]  ;;  %v233_v9 = vld [vmem:[#allocation2 + $0x18] sm:$0xff]  ;;  %v2712_v11 = vld [vmem:[#allocation2 + $0x8] ss:$0 sm:$0xff]  ;;  %s3698_s1 = smov 124   ;;  %vm692_vm5 = vcmask 523264  }
  0x29   :  { %3005 = vmatmul.mubr.msk.f32.vlgmr.msra.gmra.mrb[0].mxu0 %vm62_vm0, %v52_v2  ;;  %v3292_v10 = vpack.c.bf16 %v233_v9, %v232_v8  ;;  %v397_v18 = vld [vmem:[#allocation2 + $0x28] sm:$0xff]  ;;  %v398_v19 = vld [vmem:[#allocation2 + $0x30] sm:$0xff]  ;;  %v399_v24 = vld [vmem:[#allocation2 + $0x38] sm:$0xff]  ;;  %vm3702_vm10 = vmmov 0   ;;  %vm2702_vm11 = vcmask 1024  }
  0x2a   :  { %3011 = vmatprep.mubr.msk.f32.mxu0 %vm148_vm1, %v53_v3  ;;  %v3300_v23 = vpack.c.bf16 %v398_v19, %v397_v18  ;;  %v400_v25 = vld [vmem:[#allocation2 + $0x40] sm:$0xff]  ;;  %v401_v27 = vld [vmem:[#allocation2 + $0x48] sm:$0xff]  ;;  %v402_v28 = vld [vmem:[#allocation2 + $0x50] sm:$0xff] }
  0x2b   :  { %v3304_v26 = vpack.c.bf16 %v400_v25, %v399_v24  ;;  %v403_v29 = vld [vmem:[#allocation2 + $0x58] sm:$0xff]  ;;  %v3308_v30 = vpack.c.bf16 %v402_v28, %v401_v27  ;;  %v404_v31 = vld [vmem:[#allocation2 + $0x60] sm:$0xff]  ;;  %v405_v33 = vld [vmem:[#allocation2 + $0x68] sm:$0xff] }
  0x2c   :  { %v3312_v32 = vpack.c.bf16 %v404_v31, %v403_v29  ;;  %v406_v34 = vld [vmem:[#allocation2 + $0x70] sm:$0xff]  ;;  %v407_v36 = vld [vmem:[#allocation2 + $0x78] sm:$0xff]  ;;  %v408_v37 = vld [vmem:[#allocation2 + $0x80] sm:$0xff] }
  0x2d   :  { %3309 = vmatprep.subr.bf16.mxu1 %v3308_v30  ;;  %v3316_v35 = vpack.c.bf16 %v406_v34, %v405_v33  ;;  %v3320_v38 = vpack.c.bf16 %v408_v37, %v407_v36  ;;  %v409_v39 = vld [vmem:[#allocation2 + $0x88] sm:$0xff]  ;;  %v410_v40 = vld [vmem:[#allocation2 + $0x90] sm:$0xff]  ;;  %v411_v42 = vld [vmem:[#allocation2 + $0x98] sm:$0xff] }
  0x2e   :  { %3311 = vmatpush3.bf16.msra.mxu1 %v3308_v30  ;;  %v3324_v41 = vpack.c.bf16 %v410_v40, %v409_v39  ;;  %v412_v43 = vld [vmem:[#allocation2 + $0xa0] sm:$0xff]  ;;  %v413_v45 = vld [vmem:[#allocation2 + $0xa8] sm:$0xff]  ;;  %v414_v46 = vld [vmem:[#allocation2 + $0xb0] sm:$0xff] }
  0x2f   :  { %3313 = vmatprep.subr.bf16.mxu1 %v3312_v32  ;;  %v3328_v44 = vpack.c.bf16 %v412_v43, %v411_v42  ;;  %v3332_v47 = vpack.c.bf16 %v414_v46, %v413_v45  ;;  %v415_v48 = vld [vmem:[#allocation2 + $0xb8] sm:$0xff]  ;;  %v416_v49 = vld [vmem:[#allocation2 + $0xc0] sm:$0xff]  ;;  %v3806_v61 = vld [vmem:[#allocation2 + $0xd0] sm:$0xf] }
  0x30   :  { %v3336_v50 = vpack.c.bf16 %v416_v49, %v415_v48  ;;  %v2717_v51 = vld [vmem:[#allocation2 + $0x20] ss:$0 sm:$0xff]  ;;  %v3820_v2 = vld [vmem:[#allocation2 + $0x3a8] sm:$0xff]  ;;  %v422_v39 = vld [vmem:[#allocation2 + $0xf0] sm:$0xff] }
  0x31   :  { %v3831_v25 = vld [vmem:[%s4045_s2] sm:$0xff]  ;;  %v3836_v29 = vld [vmem:[%s4045_s2 + $0x8] sm:$0xff]  ;;  %v426_v45 = vld [vmem:[#allocation2 + $0x110] sm:$0xff]  ;;  %s3700_s2 = smov 120  }
  0x32   :  { %3315 = vmatpush3.bf16.msra.mxu1 %v3312_v32  ;;  %v420_v36 = vld [vmem:[#allocation2 + $0xe0] sm:$0xff] }
  0x33   :  { %3317 = vmatprep.subr.bf16.mxu1 %v3316_v35  ;;  %v424_v42 = vld [vmem:[#allocation2 + $0x100] sm:$0xff] }
  0x36   :  { %3319 = vmatpush3.bf16.msra.mxu1 %v3316_v35  ;;  %v419_v35 = vld [vmem:[#allocation2 + $0xd8] sm:$0xff] }
  0x37   :  { %3321 = vmatprep.subr.bf16.mxu1 %v3320_v38  ;;  %v3340_v37 = vpack.c.bf16 %v420_v36, %v419_v35  ;;  %v1210_v35 = vld [vmem:[#allocation4 + $0x58] sm:$0xff] }
  0x3a   :  { %3323 = vmatpush3.bf16.msra.mxu1 %v3320_v38  ;;  %v421_v38 = vld [vmem:[#allocation2 + $0xe8] sm:$0xff] }
  0x3b   :  { %3325 = vmatprep.subr.bf16.mxu1 %v3324_v41  ;;  %v3344_v40 = vpack.c.bf16 %v422_v39, %v421_v38  ;;  %v1207_v38 = vld [vmem:[#allocation4 + $0x40] sm:$0xff]  ;;  %v1209_v39 = vld [vmem:[#allocation4 + $0x50] sm:$0xff] }
  0x3e   :  { %3327 = vmatpush3.bf16.msra.mxu1 %v3324_v41  ;;  %v423_v41 = vld [vmem:[#allocation2 + $0xf8] sm:$0xff] }
  0x3f   :  { %3329 = vmatprep.subr.bf16.mxu1 %v3328_v44  ;;  %v3348_v43 = vpack.c.bf16 %v424_v42, %v423_v41  ;;  %v1214_v41 = vld [vmem:[#allocation4 + $0x78] sm:$0xff]  ;;  %v3386_v42 = vpack.c.bf16 %v1209_v39, %v1207_v38 }
  0x40   :  { %v441_v38 = vld [vmem:[#allocation2 + $0x188] sm:$0xff] }
  0x42   :  { %3331 = vmatpush3.bf16.msra.mxu1 %v3328_v44  ;;  %v425_v44 = vld [vmem:[#allocation2 + $0x108] sm:$0xff] }
  0x43   :  { %3333 = vmatprep.subr.bf16.mxu1 %v3332_v47  ;;  %v3352_v46 = vpack.c.bf16 %v426_v45, %v425_v44  ;;  %v1211_v44 = vld [vmem:[#allocation4 + $0x60] sm:$0xff]  ;;  %v1213_v45 = vld [vmem:[#allocation4 + $0x70] sm:$0xff] }
  0x46   :  { %3335 = vmatpush3.bf16.msra.mxu1 %v3332_v47 }
  0x47   :  { %3337 = vmatprep.subr.bf16.mxu1 %v3336_v50 }
  0x4a   :  { %3339 = vmatpush3.bf16.msra.mxu1 %v3336_v50 }
  0xfc   :  { %v3006_v4 = vpop.f32.mrb[0].mxu0 }
  0xfd   :  { %v135_v5 = vpop.f32.mrb[1].mxu0 }
  0xfe   :  { %v3288_v6 = vpack.c.bf16 %v3006_v4, %v135_v5 }
 0x100   :  { %3289 = vmatprep.subr.bf16.mxu0 %v3288_v6 }
 0x101   :  { %3291 = vmatpush3.bf16.msra.mxu0 %v3288_v6 }
 0x102   :  { %3293 = vmatprep.subr.bf16.mxu0 %v3292_v10 }
 0x104   :  { %3012 = vmatmul.mubr.msk.f32.vlgmr.msra.gmra.mrb[2].mxu0 %vm148_vm1, %v54_v7 }
 0x105   :  { %3295 = vmatpush3.bf16.msra.mxu0 %v3292_v10 }
 0x1d7   :  { %v3013_v12 = vpop.f32.mrb[2].mxu0 }
 0x1d8   :  { %v3778_v13 = vadd.f32 %v3013_v12, %v2712_v11  ;;  %v221_v14 = vpop.f32.mrb[3].mxu0 }
 0x1d9   :  { %v3780_v15 = vadd.f32 %v2712_v11, %v221_v14 }
 0x1da   :  { %v231_v17 = vmax.f32 %v3778_v13, 0.0  ;;  %v2341_v13 = vld [vmem:[#allocation2 + $0x438] sm:$0xff] }
 0x1db   :  { %v230_v16 = vmax.f32 %v3780_v15, 0.0  ;;  %v2336_v15 = vld [vmem:[#allocation2 + $0x410] sm:$0xff] }
 0x1dd   :  { %3018 = vmatprep.mubr.msk.f32.mxu0 %vm148_vm1, %v230_v16 }
 0x1de   :  { %3019 = vmatmul.mubr.msk.f32.vlgmr.msra.gmra.mrb[4].mxu0 %vm148_vm1, %v231_v17 }
 0x1df   :  { %3025 = vmatprep.mubr.msk.f32.mxu0 %vm148_vm1, %v53_v3  ;;  %v3822_v3 = vld [vmem:[#allocation2 + $0x3a0] sm:$0xff] }
 0x2b1   :  { %v3020_v20 = vpop.f32.mrb[4].mxu0 }
 0x2b2   :  { %v307_v21 = vpop.f32.mrb[5].mxu0 }
 0x2b3   :  { %v3296_v22 = vpack.c.bf16 %v3020_v20, %v307_v21 }
 0x2b5   :  { %3297 = vmatprep.subr.bf16.mxu0 %v3296_v22 }
 0x2b6   :  { %3299 = vmatpush3.bf16.msra.mxu0 %v3296_v22 }
 0x2b7   :  { %3301 = vmatprep.subr.bf16.mxu0 %v3300_v23 }
 0x2b9   :  { %3026 = vmatmul.mubr.msk.f32.vlgmr.msra.gmra.mrb[6].mxu0 %vm148_vm1, %v54_v7 }
 0x2ba   :  { %3303 = vmatpush3.bf16.msra.mxu0 %v3300_v23 }
 0x2bb   :  { %3305 = vmatprep.subr.bf16.mxu0 %v3304_v26 }
 0x2be   :  { %3307 = vmatpush3.bf16.msra.mxu0 %v3304_v26 }
 0x2bf   :  { %3074 = vmatprep.subr.msk.mxu0 %vm611_vm3, %v3806_v61 }
 0x38c   :  { %v3027_v52 = vpop.f32.mrb[6].mxu0 }
 0x38d   :  { %v3792_v53 = vadd.f32 %v3027_v52, %v2717_v51  ;;  %v386_v54 = vpop.f32.mrb[7].mxu0 }
 0x38e   :  { %v3794_v55 = vadd.f32 %v2717_v51, %v386_v54 }
 0x38f   :  { %v396_v57 = vmax.f32 %v3792_v53, 0.0 }
 0x390   :  { %v395_v56 = vmax.f32 %v3794_v55, 0.0 }
 0x392   :  { %3036 = vmatprep.mubr.msk.f32.mxu0 %vm443_vm2, %v395_v56 }
 0x393   :  { %3037 = vmatmul.mubr.msk.f32.vlgmr.msra.gmra.mrb[8].mxu0 %vm443_vm2, %v396_v57 }
 0x394   :  { %3075 = vmatpush3.msk.msra.mxu0 %vm611_vm3, %v3806_v61 }
 0x395   :  { %3079 = vmatprep.subr.msk.mxu0 %vm611_vm3, %v3806_v61 }
 0x466   :  { %v3038_v58 = vpop.f32.mrb[8].mxu0 }
 0x467   :  { %v516_v59 = vpop.f32.mrb[9].mxu0 }
 0x468   :  { %v3804_v60 = vpack.c.bf16 %v3038_v58, %v516_v59  ;;  %3071 = vmatprep.mubr.f32.mxu1 %v516_v59 }
 0x469   :  { %3072 = vmatmul.mubr.f32.vlgmr.msra.gmra.mrb[0].mxu1 %v3038_v58 }
 0x53c   :  { %v3073_v62 = vpop.f32.mrb[0].mxu1 }
 0x53d   :  { %v591_v63 = vpop.f32.mrb[1].mxu1 }
 0x53e   :  { %602 = vrot.lane.b32.xlu0 %v591_v63, %s3698_s1 }
 0x542   :  { %604 = vrot.lane.b32.xlu0 %v3073_v62, %s3698_s1 }
 0x5b0   :  { %v603_v0 = vpop.permute.xlu0 %602 }
 0x5b1   :  { %3076 = vmatprep.mubr.msk.f32.mxu0 %vm606_vm4, %v603_v0 }
 0x5b4   :  { %v605_v1 = vpop.permute.xlu0 %604 }
 0x5b5   :  { %3077 = vmatmul.mubr.msk.f32.vlgmr.msra.gmra.mrb[10].mxu0 %vm606_vm4, %v605_v1 }
 0x5b6   :  { %3081 = vmatprep.mubr.msk.f32.mxu0 %vm606_vm4, %v591_v63  ;;  %3080 = vmatpush3.msk.msra.mxu0 %vm611_vm3, %v3806_v61 }
 0x5b7   :  { %3341 = vmatprep.subr.bf16.mxu0 %v3340_v37 }
 0x5b9   :  { %3082 = vmatmul.mubr.msk.f32.vlgmr.msra.gmra.mrb[12].mxu0 %vm606_vm4, %v3073_v62 }
 0x5ba   :  { %3343 = vmatpush3.bf16.msra.mxu0 %v3340_v37 }
 0x5bb   :  { %3345 = vmatprep.subr.bf16.mxu0 %v3344_v40 }
 0x5be   :  { %3347 = vmatpush3.bf16.msra.mxu0 %v3344_v40  ;;  %v1212_v40 = vld [vmem:[#allocation4 + $0x68] sm:$0xff] }
 0x5bf   :  { %3349 = vmatprep.subr.bf16.mxu0 %v3348_v43 }
 0x5c2   :  { %3351 = vmatpush3.bf16.msra.mxu0 %v3348_v43  ;;  %v3388_v43 = vpack.c.bf16 %v1214_v41, %v1212_v40 }
 0x5c3   :  { %3353 = vmatprep.subr.bf16.mxu0 %v3352_v46 }
 0x5c6   :  { %3355 = vmatpush3.bf16.msra.mxu0 %v3352_v46  ;;  %v1216_v46 = vld [vmem:[#allocation4 + $0x88] sm:$0xff] }
 0x5c7   :  { %3103 = vmatprep.subr.msk.mxu0 %vm611_vm3, %v3806_v61 }
 0x688   :  { %v3078_v4 = vpop.f32.mrb[10].mxu0 }
 0x689   :  { %v691_v5 = vmul.f32 %v3078_v4, %v3820_v2  ;;  %v681_v6 = vpop.f32.mrb[11].mxu0 }
 0x68a   :  { %v690_v7 = vmul.f32 %v681_v6, %v3822_v3 }
 0x68b   :  { %v694_v8 = vsel %vm692_vm5, %v691_v5, 0.0 }
 0x68c   :  { %v693_v9 = vsel %vm692_vm5, %v690_v7, 0.0  ;;  %v3083_v10 = vpop.f32.mrb[12].mxu0 }
 0x68d   :  { %v695_v11 = vadd.f32 %v694_v8, %v693_v9  ;;  %v772_v12 = vpop.f32.mrb[13].mxu0 }
 0x68f   :  { %v696_v14 = vrot.slane %v695_v11, 4 }
 0x691   :  { %v697_v18 = vadd.f32 %v696_v14, %v695_v11  ;;  %v427_v11 = vld [vmem:[#allocation2 + $0x118] sm:$0xff]  ;;  %v430_v14 = vld [vmem:[#allocation2 + $0x130] sm:$0xff] }
 0x693   :  { %v698_v19 = vrot.slane %v697_v18, 2 }
 0x695   :  { %v699_v20 = vadd.f32 %v698_v19, %v697_v18  ;;  %v431_v18 = vld [vmem:[#allocation2 + $0x138] sm:$0xff]  ;;  %v432_v19 = vld [vmem:[#allocation2 + $0x140] sm:$0xff] }
 0x697   :  { %v700_v21 = vrot.slane %v699_v20, 1 }
 0x699   :  { %v701_v22 = vadd.f32 %v700_v21, %v699_v20  ;;  %v433_v20 = vld [vmem:[#allocation2 + $0x148] sm:$0xff]  ;;  %v1200_v21 = vld [vmem:[#allocation4 + $0x8] sm:$0xff] }
 0x69b   :  { %v778_v23 = vadd.f32 %v3083_v10, %v701_v22  ;;  %v773_v24 = vadd.f32 %v772_v12, %v701_v22  ;;  %v429_v12 = vld [vmem:[#allocation2 + $0x128] sm:$0xff] }
 0x69c   :  { %v1202_v22 = vld [vmem:[#allocation4 + $0x18] sm:$0xff] }
 0x69d   :  { %vm782_vm6 = vcmp.ge.f32.partialorder %v778_v23, 0.0  ;;  %v784_v26 = vmul.f32 0.2, %v778_v23  ;;  %v783_v27 = vmul.f32 0.2, %v773_v24  ;;  %vm781_vm7 = vcmp.ge.f32.partialorder %v773_v24, 0.0 }
 0x69f   :  { %v785_v28 = vsel %vm781_vm7, %v773_v24, %v783_v27  ;;  %v786_v30 = vsel %vm782_vm6, %v778_v23, %v784_v26  ;;  %v1199_v23 = vld [vmem:[#allocation4] sm:$0xff]  ;;  %v3376_v24 = vpack.c.bf16 %v1202_v22, %v1200_v21  ;;  %v1201_v26 = vld [vmem:[#allocation4 + $0x10] sm:$0xff]  ;;  %v1204_v27 = vld [vmem:[#allocation4 + $0x28] sm:$0xff] }
 0x6a0   :  { %v787_v31 = vadd.f32 %v785_v28, %v3831_v25  ;;  %v788_v33 = vadd.f32 %v786_v30, %v3836_v29  ;;  %v1206_v28 = vld [vmem:[#allocation4 + $0x38] sm:$0xff]  ;;  %v3378_v30 = vpack.c.bf16 %v1201_v26, %v1199_v23  ;;  %v438_v22 = vld [vmem:[#allocation2 + $0x170] sm:$0xff] }
 0x6a1   :  { %3377 = vmatprep.subr.bf16.mxu1 %v3376_v24  ;;  %v437_v23 = vld [vmem:[#allocation2 + $0x168] sm:$0xff] }
 0x6a2   :  { %v789_v32 = vsel %vm692_vm5, %v787_v31, -inf  ;;  %v792_v34 = vsel %vm692_vm5, %v788_v33, -inf  ;;  %3379 = vmatpush1.bf16.msra.mxu1 %v3378_v30 }
 0x6a3   :  { %790 = vmax.xlane.f32.xlu1 %v789_v32  ;;  %v1203_v32 = vld [vmem:[#allocation4 + $0x20] sm:$0xff] }
 0x6a7   :  { %793 = vmax.xlane.f32.xlu1 %v792_v34  ;;  %v1208_v34 = vld [vmem:[#allocation4 + $0x48] sm:$0xff] }
 0x6a8   :  { %v3384_v37 = vpack.c.bf16 %v1210_v35, %v1208_v34 }
 0x730   :  { %v791_v47 = vpop.xlane.xlu1 %790 }
 0x731   :  { %v795_v48 = vsub.f32 %v787_v31, %v791_v47  ;;  %v3380_v31 = vpack.c.bf16 %v1206_v28, %v1204_v27  ;;  %v1218_v47 = vld [vmem:[#allocation4 + $0x98] sm:$0xff] }
 0x733   :  { %v797_v49 = vmul.f32 1.442695, %v795_v48  ;;  %3381 = vmatprep.subr.bf16.mxu1 %v3380_v31  ;;  %v3390_v48 = vpack.c.bf16 %v1213_v45, %v1211_v44  ;;  %v440_v31 = vld [vmem:[#allocation2 + $0x180] sm:$0xff] }
 0x734   :  { %v794_v50 = vpop.xlane.xlu1 %793 }
 0x735   :  { %3628 = vpow2.f32 %v797_v49  ;;  %v796_v51 = vsub.f32 %v788_v33, %v794_v50  ;;  %v1205_v33 = vld [vmem:[#allocation4 + $0x30] sm:$0xff]  ;;  %v3392_v49 = vpack.c.bf16 %v1218_v47, %v1216_v46  ;;  %v1215_v50 = vld [vmem:[#allocation4 + $0x80] sm:$0xff]  ;;  %v1228_v46 = vld [vmem:[#allocation4 + $0xe8] sm:$0xff] }
 0x736   :  { %v3382_v36 = vpack.c.bf16 %v1205_v33, %v1203_v32  ;;  %v439_v32 = vld [vmem:[#allocation2 + $0x178] sm:$0xff]  ;;  %v1230_v47 = vld [vmem:[#allocation4 + $0xf8] sm:$0xff] }
 0x737   :  { %v799_v52 = vmul.f32 1.442695, %v796_v51  ;;  %v1217_v51 = vld [vmem:[#allocation4 + $0x90] sm:$0xff] }
 0x738   :  { %3383 = vmatpush1.bf16.msra.mxu1 %v3382_v36 }
 0x739   :  { %3630 = vpow2.f32 %v799_v52  ;;  %3385 = vmatprep.subr.bf16.mxu1 %v3384_v37  ;;  %v1220_v52 = vld [vmem:[#allocation4 + $0xa8] sm:$0xff]  ;;  %v442_v37 = vld [vmem:[#allocation2 + $0x190] sm:$0xff] }
 0x73c   :  { %3387 = vmatpush1.bf16.msra.mxu1 %v3386_v42 }
 0x73d   :  { %3389 = vmatprep.subr.bf16.mxu1 %v3388_v43 }
 0x73f   :  { %v3844_v54 = vpop.eup %3628 }
 0x740   :  { %3100 = vmatprep.mubr.msk.f32.mxu0 %vm692_vm5, %v3844_v54  ;;  %3391 = vmatpush1.bf16.msra.mxu1 %v3390_v48  ;;  %v3404_v48 = vpack.c.bf16 %v1230_v47, %v1228_v46  ;;  %v2741_v46 = vld [vmem:[#allocation2 + $0xc8] ss:$0 sm:$0xff] }
 0x741   :  { %3393 = vmatprep.subr.bf16.mxu1 %v3392_v49  ;;  %v1227_v49 = vld [vmem:[#allocation4 + $0xe0] sm:$0xff] }
 0x743   :  { %v3848_v58 = vpop.eup %3630 }
 0x744   :  { %3101 = vmatmul.mubr.msk.f32.vlgmr.msra.gmra.mrb[14].mxu0 %vm692_vm5, %v3848_v58 }
 0x745   :  { %3104 = vmatpush3.msk.msra.mxu0 %vm611_vm3, %v3806_v61  ;;  %v428_v61 = vld [vmem:[#allocation2 + $0x120] sm:$0xff] }
 0x746   :  { %3357 = vmatprep.subr.bf16.mxu0 %v3804_v60 }
 0x817   :  { %v3102_v59 = vpop.f32.mrb[14].mxu0 }
 0x818   :  { %v883_v62 = vmax.f32 %v3102_v59, 1e-30  ;;  %v873_v63 = vpop.f32.mrb[15].mxu0  ;;  %v1222_v59 = vld [vmem:[#allocation4 + $0xb8] sm:$0xff] }
 0x819   :  { %v882_v0 = vmax.f32 %v873_v63, 1e-30  ;;  %v3396_v63 = vpack.c.bf16 %v1222_v59, %v1220_v52  ;;  %v3699_v52 = vmov 0.0   ;;  %v1247_v59 = vld [vmem:[#allocation2 + $0x218] sm:$0xff] }
 0x81a   :  { %3632 = vrcp.f32 %v883_v62  ;;  %1394 = vmatprep.mubr.f32.mxu1 %v3699_v52 }
 0x81b   :  { %3634 = vrcp.f32 %v882_v0 }
 0x824   :  { %v3633_v1 = vpop.eup %3632 }
 0x825   :  { %v3635_v4 = vpop.eup %3634  ;;  %v887_v5 = vmul.f32 %v3633_v1, %v883_v62  ;;  %v3394_v62 = vpack.c.bf16 %v1217_v51, %v1215_v50  ;;  %v1229_v50 = vld [vmem:[#allocation4 + $0xf0] sm:$0xff] }
 0x826   :  { %v886_v6 = vmul.f32 %v3635_v4, %v882_v0  ;;  %v1219_v0 = vld [vmem:[#allocation4 + $0xa0] sm:$0xff]  ;;  %v3406_v51 = vpack.c.bf16 %v1229_v50, %v1227_v49 }
 0x827   :  { %v889_v7 = vsub.f32 2.0, %v887_v5  ;;  %v1226_v5 = vld [vmem:[#allocation4 + $0xd8] sm:$0xff]  ;;  %3395 = vmatpush1.bf16.msra.mxu1 %v3394_v62  ;;  %v1248_v62 = vld [vmem:[#allocation2 + $0x220] sm:$0xff] }
 0x828   :  { %v888_v8 = vsub.f32 2.0, %v886_v6  ;;  %3397 = vmatprep.subr.bf16.mxu1 %v3396_v63  ;;  %v1231_v63 = vld [vmem:[#allocation2 + $0x198] sm:$0xff] }
 0x829   :  { %v891_v10 = vmul.f32 %v3633_v1, %v889_v7  ;;  %v1221_v1 = vld [vmem:[#allocation4 + $0xb0] sm:$0xff] }
 0x82a   :  { %v890_v9 = vmul.f32 %v3635_v4, %v888_v8  ;;  %v1224_v4 = vld [vmem:[#allocation4 + $0xc8] sm:$0xff]  ;;  %v3398_v6 = vpack.c.bf16 %v1221_v1, %v1219_v0  ;;  %v1223_v8 = vld [vmem:[#allocation4 + $0xc0] sm:$0xff]  ;;  %v3408_v0 = vpack.c.bf16 %v1248_v62, %v1247_v59  ;;  %v1232_v1 = vld [vmem:[#allocation2 + $0x1a0] sm:$0xff] }
 0x82b   :  { %v3400_v7 = vpack.c.bf16 %v1226_v5, %v1224_v4  ;;  %v1249_v4 = vld [vmem:[#allocation2 + $0x228] sm:$0xff]  ;;  %v3410_v5 = vpack.c.bf16 %v1232_v1, %v1231_v63  ;;  %v1246_v63 = vld [vmem:[#allocation2 + $0x210] sm:$0xff]  ;;  %v1265_v1 = vld [vmem:[#allocation2 + $0x298] sm:$0xff] }
 0x82c   :  { %3105 = vmatprep.mubr.msk.f32.mxu0 %vm606_vm4, %v890_v9  ;;  %v1225_v9 = vld [vmem:[#allocation4 + $0xd0] sm:$0xff]  ;;  %3399 = vmatpush1.bf16.msra.mxu1 %v3398_v6  ;;  %v1245_v62 = vld [vmem:[#allocation2 + $0x208] sm:$0xff] }
 0x82d   :  { %3106 = vmatmul.mubr.msk.f32.vlgmr.msra.gmra.mrb[16].mxu0 %vm606_vm4, %v891_v10  ;;  %v3402_v10 = vpack.c.bf16 %v1225_v9, %v1223_v8  ;;  %3401 = vmatprep.subr.bf16.mxu1 %v3400_v7  ;;  %v1233_v7 = vld [vmem:[#allocation2 + $0x1a8] sm:$0xff]  ;;  %v1234_v8 = vld [vmem:[#allocation2 + $0x1b0] sm:$0xff]  ;;  %v1251_v9 = vld [vmem:[#allocation2 + $0x238] sm:$0xff] }
 0x82e   :  { %3359 = vmatpush3.bf16.msra.mxu0 %v3804_v60  ;;  %3112 = vmatprep.mubr.msk.f32.mxu0 %vm148_vm1, %v427_v11  ;;  %v434_v60 = vld [vmem:[#allocation2 + $0x150] sm:$0xff] }
 0x830   :  { %3403 = vmatpush1.bf16.msra.mxu1 %v3402_v10  ;;  %v1252_v10 = vld [vmem:[#allocation2 + $0x240] sm:$0xff] }
 0x831   :  { %3113 = vmatmul.mubr.msk.f32.vlgmr.msra.gmra.mrb[18].mxu0 %vm148_vm1, %v428_v61  ;;  %3405 = vmatprep.subr.bf16.mxu1 %v3404_v48 }
 0x832   :  { %3115 = vmatprep.mubr.msk.f32.mxu0 %vm148_vm1, %v429_v12 }
 0x834   :  { %3407 = vmatpush1.bf16.msra.mxu1 %v3406_v51 }
 0x835   :  { %3116 = vmatmul.mubr.msk.f32.gmra.mrb[20].mxu0 %vm148_vm1, %v430_v14  ;;  %v436_v14 = vld [vmem:[#allocation2 + $0x160] sm:$0xff]  ;;  %3143 = vmatprep.subr.mxu1 %v1265_v1 }
 0x836   :  { %3118 = vmatprep.mubr.msk.f32.mxu0 %vm148_vm1, %v431_v18  ;;  %v435_v18 = vld [vmem:[#allocation2 + $0x158] sm:$0xff] }
 0x839   :  { %3119 = vmatmul.mubr.msk.f32.gmra.mrb[22].mxu0 %vm148_vm1, %v432_v19 }
 0x83a   :  { %3121 = vmatprep.mubr.msk.f32.mxu0 %vm148_vm1, %v433_v20 }
 0x83d   :  { %3122 = vmatmul.mubr.msk.f32.gmra.mrb[24].mxu0 %vm148_vm1, %v434_v60 }
 0x900   :  { %v3107_v11 = vpop.f32.mrb[16].mxu0 }
 0x901   :  { %v964_v61 = vpop.f32.mrb[17].mxu0  ;;  %v974_v45 = vmul.f32 %v3848_v58, %v3107_v11  ;;  %v1250_v58 = vld [vmem:[#allocation2 + $0x230] sm:$0xff]  ;;  %v3414_v11 = vpack.c.bf16 %v1234_v8, %v1233_v7 }
 0x902   :  { %v973_v12 = vmul.f32 %v3844_v54, %v964_v61  ;;  %v3412_v6 = vpack.c.bf16 %v1250_v58, %v1249_v4  ;;  %v3416_v61 = vpack.c.bf16 %v1252_v10, %v1251_v9 }
 0x904   :  { %v3114_v19 = vpop.f32.mrb[18].mxu0  ;;  %3140 = vmatprep.mubr.msk.f32.mxu0 %vm692_vm5, %v973_v12  ;;  %v1235_v12 = vld [vmem:[#allocation2 + $0x1b8] sm:$0xff] }
 0x905   :  { %v1105_v20 = vmul.f32 %v3114_v19, %v436_v14  ;;  %v1065_v60 = vpop.f32.mrb[19].mxu0  ;;  %v1236_v14 = vld [vmem:[#allocation2 + $0x1c0] sm:$0xff]  ;;  %v1254_v19 = vld [vmem:[#allocation2 + $0x250] sm:$0xff] }
 0x906   :  { %v1104_v21 = vmul.f32 %v1065_v60, %v435_v18  ;;  %v1253_v18 = vld [vmem:[#allocation2 + $0x248] sm:$0xff] }
 0x907   :  { %v3420_v60 = vpack.c.bf16 %v1254_v19, %v1253_v18  ;;  %v1266_v19 = vld [vmem:[#allocation2 + $0x2a0] sm:$0xff] }
 0x908   :  { %v3360_v24 = vpack.c.bf16 %v1105_v20, %v1104_v21  ;;  %v3117_v26 = vpop.f32.mrb[20].mxu0  ;;  %v3418_v20 = vpack.c.bf16 %v1236_v14, %v1235_v12  ;;  %v1237_v21 = vld [vmem:[#allocation2 + $0x1c8] sm:$0xff] }
 0x909   :  { %v1107_v27 = vmul.f32 %v3117_v26, %v438_v22  ;;  %v1075_v28 = vpop.f32.mrb[21].mxu0  ;;  %v1238_v22 = vld [vmem:[#allocation2 + $0x1d0] sm:$0xff] }
 0x90a   :  { %v1106_v30 = vmul.f32 %v1075_v28, %v437_v23  ;;  %3361 = vmatprep.subr.bf16.mxu0 %v3360_v24  ;;  %v1255_v23 = vld [vmem:[#allocation2 + $0x258] sm:$0xff]  ;;  %v3422_v26 = vpack.c.bf16 %v1238_v22, %v1237_v21  ;;  %v1268_v22 = vld [vmem:[#allocation2 + $0x2b0] sm:$0xff] }
 0x90b   :  { %3363 = vmatpush3.bf16.msra.mxu0 %v3360_v24  ;;  %v1256_v24 = vld [vmem:[#allocation2 + $0x260] sm:$0xff]  ;;  %v1239_v28 = vld [vmem:[#allocation2 + $0x1d8] sm:$0xff] }
 0x90c   :  { %v3364_v54 = vpack.c.bf16 %v1107_v27, %v1106_v30  ;;  %v3120_v33 = vpop.f32.mrb[22].mxu0  ;;  %v3424_v27 = vpack.c.bf16 %v1256_v24, %v1255_v23  ;;  %v1240_v30 = vld [vmem:[#allocation2 + $0x1e0] sm:$0xff]  ;;  %v1269_v23 = vld [vmem:[#allocation2 + $0x2b8] sm:$0xff] }
 0x90d   :  { %v1109_v34 = vmul.f32 %v3120_v33, %v440_v31  ;;  %v1085_v35 = vpop.f32.mrb[23].mxu0  ;;  %v1257_v31 = vld [vmem:[#allocation2 + $0x268] sm:$0xff]  ;;  %v3444_v24 = vpack.c.bf16 %v1269_v23, %v1268_v22 }
 0x90e   :  { %v1108_v36 = vmul.f32 %v1085_v35, %v439_v32  ;;  %3365 = vmatprep.subr.bf16.mxu0 %v3364_v54  ;;  %v1258_v32 = vld [vmem:[#allocation2 + $0x270] sm:$0xff] }
 0x90f   :  { %3367 = vmatpush3.bf16.msra.mxu0 %v3364_v54  ;;  %v3426_v54 = vpack.c.bf16 %v1240_v30, %v1239_v28  ;;  %v3428_v33 = vpack.c.bf16 %v1258_v32, %v1257_v31  ;;  %v1242_v35 = vld [vmem:[#allocation2 + $0x1f0] sm:$0xff]  ;;  %v1273_v31 = vld [vmem:[#allocation2 + $0x2d8] sm:$0xff] }
 0x910   :  { %v3368_v39 = vpack.c.bf16 %v1109_v34, %v1108_v36  ;;  %v3123_v40 = vpop.f32.mrb[24].mxu0  ;;  %v1241_v34 = vld [vmem:[#allocation2 + $0x1e8] sm:$0xff]  ;;  %v1259_v36 = vld [vmem:[#allocation2 + $0x278] sm:$0xff]  ;;  %v1272_v30 = vld [vmem:[#allocation2 + $0x2d0] sm:$0xff] }
 0x911   :  { %v1111_v41 = vmul.f32 %v3123_v40, %v442_v37  ;;  %v1095_v42 = vpop.f32.mrb[25].mxu0  ;;  %v1260_v37 = vld [vmem:[#allocation2 + $0x280] sm:$0xff]  ;;  %v1243_v40 = vld [vmem:[#allocation2 + $0x1f8] sm:$0xff]  ;;  %v3452_v32 = vpack.c.bf16 %v1273_v31, %v1272_v30  ;;  %v1296_v30 = vld [vmem:[#allocation2 + $0x390] sm:$0xff] }
 0x912   :  { %v1110_v43 = vmul.f32 %v1095_v42, %v441_v38  ;;  %3369 = vmatprep.subr.bf16.mxu0 %v3368_v39  ;;  %v3430_v38 = vpack.c.bf16 %v1242_v35, %v1241_v34  ;;  %v1261_v42 = vld [vmem:[#allocation2 + $0x288] sm:$0xff]  ;;  %v1276_v35 = vld [vmem:[#allocation2 + $0x2f0] sm:$0xff]  ;;  %v1297_v31 = vld [vmem:[#allocation2 + $0x398] sm:$0xff] }
 0x913   :  { %3371 = vmatpush3.bf16.msra.mxu0 %v3368_v39  ;;  %v3432_v39 = vpack.c.bf16 %v1260_v37, %v1259_v36  ;;  %v1277_v36 = vld [vmem:[#allocation2 + $0x2f8] sm:$0xff] }
 0x914   :  { %v3372_v44 = vpack.c.bf16 %v1111_v41, %v1110_v43  ;;  %v1244_v41 = vld [vmem:[#allocation2 + $0x200] sm:$0xff]  ;;  %v1262_v43 = vld [vmem:[#allocation2 + $0x290] sm:$0xff]  ;;  %v3460_v37 = vpack.c.bf16 %v1277_v36, %v1276_v35 }
 0x916   :  { %3373 = vmatprep.subr.bf16.mxu0 %v3372_v44 }
 0x917   :  { %3375 = vmatpush3.bf16.msra.mxu0 %v3372_v44  ;;  %v3434_v44 = vpack.c.bf16 %v1244_v41, %v1243_v40  ;;  %v1280_v41 = vld [vmem:[#allocation2 + $0x310] sm:$0xff] }
 0x918   :  { %3409 = vmatprep.subr.bf16.mxu0 %v3408_v0  ;;  %v3438_v0 = vpack.c.bf16 %v1246_v63, %v1245_v62 }
 0x91a   :  { %3141 = vmatmul.mubr.msk.f32.vlgmr.msra.gmra.mrb[26].mxu0 %vm692_vm5, %v974_v45  ;;  %v3436_v45 = vpack.c.bf16 %v1262_v43, %v1261_v42  ;;  %v1281_v42 = vld [vmem:[#allocation2 + $0x318] sm:$0xff] }
 0x91b   :  { %3411 = vmatpush3.bf16.msra.mxu0 %v3410_v5  ;;  %v3468_v43 = vpack.c.bf16 %v1281_v42, %v1280_v41 }
 0x91c   :  { %3413 = vmatprep.subr.bf16.mxu0 %v3412_v6 }
 0x91f   :  { %3415 = vmatpush3.bf16.msra.mxu0 %v3414_v11 }
 0x920   :  { %3417 = vmatprep.subr.bf16.mxu0 %v3416_v61 }
 0x923   :  { %3419 = vmatpush3.bf16.msra.mxu0 %v3418_v20  ;;  %v1267_v20 = vld [vmem:[#allocation2 + $0x2a8] sm:$0xff] }
 0x924   :  { %3421 = vmatprep.subr.bf16.mxu0 %v3420_v60  ;;  %v3440_v60 = vpack.c.bf16 %v1267_v20, %v1266_v19 }
 0x927   :  { %3423 = vmatpush3.bf16.msra.mxu0 %v3422_v26  ;;  %v1270_v26 = vld [vmem:[#allocation2 + $0x2c0] sm:$0xff] }
 0x928   :  { %3425 = vmatprep.subr.bf16.mxu0 %v3424_v27  ;;  %v1271_v27 = vld [vmem:[#allocation2 + $0x2c8] sm:$0xff] }
 0x929   :  { %v3448_v28 = vpack.c.bf16 %v1271_v27, %v1270_v26  ;;  %v1293_v26 = vld [vmem:[#allocation2 + $0x378] sm:$0xff]  ;;  %v1294_v27 = vld [vmem:[#allocation2 + $0x380] sm:$0xff] }
 0x92b   :  { %3427 = vmatpush3.bf16.msra.mxu0 %v3426_v54  ;;  %v1274_v54 = vld [vmem:[#allocation2 + $0x2e0] sm:$0xff] }
 0x92c   :  { %3429 = vmatprep.subr.bf16.mxu0 %v3428_v33  ;;  %v1275_v33 = vld [vmem:[#allocation2 + $0x2e8] sm:$0xff] }
 0x92d   :  { %v3456_v34 = vpack.c.bf16 %v1275_v33, %v1274_v54 }
 0x92f   :  { %3431 = vmatpush3.bf16.msra.mxu0 %v3430_v38  ;;  %v1278_v38 = vld [vmem:[#allocation2 + $0x300] sm:$0xff] }
 0x930   :  { %3433 = vmatprep.subr.bf16.mxu0 %v3432_v39  ;;  %v1279_v39 = vld [vmem:[#allocation2 + $0x308] sm:$0xff] }
 0x931   :  { %v3464_v40 = vpack.c.bf16 %v1279_v39, %v1278_v38 }
 0x933   :  { %3435 = vmatpush3.bf16.msra.mxu0 %v3434_v44 }
 0x934   :  { %3437 = vmatprep.subr.bf16.mxu0 %v3436_v45 }
 0x937   :  { %3439 = vmatpush3.bf16.msra.mxu0 %v3438_v0 }
 0x938   :  { %3188 = vmatprep.subr.mxu0 %v1265_v1 }
 0x9ed   :  { %v3142_v47 = vpop.f32.mrb[26].mxu0 }
 0x9ee   :  { %v1188_v48 = vpop.f32.mrb[27].mxu0  ;;  %v3873_v50 = vadd.f32 %v3142_v47, %v2741_v46 }
 0x9ef   :  { %v3871_v49 = vadd.f32 %v2741_v46, %v1188_v48 }
 0x9f0   :  { %v4050_v59 = vmax.f32 %v3873_v50, 0.0 }
 0x9f1   :  { %v4051_v51 = vmax.f32 %v3871_v49, 0.0  ;;  %v4052_v53 = vmax.f32 %v3871_v49, 0.0  ;;  %v2343_v49 = vld [vmem:[#allocation2 + $0x448] sm:$0xff] }
 0x9f3   :  { %1395 = vmatmul.mubr.f32.vlgmr.msra.gmra.mrb[2].mxu1 %v4051_v51 }
 0x9f4   :  { %1400 = vmatprep.mubr.f32.mxu1 %v3699_v52  ;;  %3144 = vmatpush3.msra.mxu1 %v1265_v1 }
 0x9f5   :  { %3148 = vmatprep.subr.mxu1 %v1265_v1 }
 0x9f7   :  { %1401 = vmatmul.mubr.f32.gmra.mrb[4].mxu1 %v4050_v59 }
 0xac6   :  { %v1396_v4 = vpop.f32.mrb[2].mxu1 }
 0xac7   :  { %v1398_v58 = vpop.f32.mrb[3].mxu1 }
 0xac8   :  { %1471 = vmatprep.mubr.f32.mxu0 %v1398_v58 }
 0xac9   :  { %1472 = vmatmul.mubr.f32.vlgmr.msra.gmra.mrb[28].mxu0 %v1396_v4 }
 0xaca   :  { %v1402_v5 = vpop.f32.mrb[4].mxu1  ;;  %3189 = vmatpush3.msra.mxu0 %v1265_v1 }
 0xacb   :  { %v3882_v6 = vpack.c.bf16 %v1402_v5, %v1396_v4  ;;  %v1404_v7 = vpop.f32.mrb[5].mxu1 }
 0xacc   :  { %v3472_v8 = vpack.c.bf16 %v1404_v7, %v1398_v58  ;;  %1476 = vmatprep.mubr.f32.mxu0 %v1404_v7 }
 0xacd   :  { %1477 = vmatmul.mubr.f32.gmra.mrb[30].mxu0 %v1402_v5 }
 0xace   :  { %3473 = vmatprep.subr.bf16.mxu0 %v3472_v8 }
 0xb9c   :  { %v2883_v9 = vpop.f32.mrb[28].mxu0 }
 0xb9d   :  { %v2884_v10 = vpop.f32.mrb[29].mxu0 }
 0xb9e   :  { %v2885_v11 = vadd.f32 %v2884_v10, %v2883_v9 }
 0xba0   :  { %1484 = vrot.lane.b32.xlu0 %v2885_v11, %s3700_s2  ;;  %v2886_v61 = vpop.f32.mrb[30].mxu0 }
 0xba1   :  { %v2887_v12 = vpop.f32.mrb[31].mxu0 }
 0xba2   :  { %v2888_v14 = vadd.f32 %v2887_v12, %v2886_v61 }
 0xba4   :  { %1486 = vrot.lane.b32.xlu1 %v2888_v14, %s3700_s2 }
 0xc12   :  { %v1485_v18 = vpop.permute.xlu0 %1484 }
 0xc13   :  { %3145 = vmatprep.mubr.msk.f32.mxu1 %vm62_vm0, %v1485_v18 }
 0xc16   :  { %v1487_v21 = vpop.permute.xlu1 %1486 }
 0xc17   :  { %3146 = vmatmul.mubr.msk.f32.vlgmr.msra.gmra.mrb[6].mxu1 %vm62_vm0, %v1487_v21 }
 0xc18   :  { %3150 = vmatprep.mubr.msk.f32.mxu1 %vm62_vm0, %v2885_v11  ;;  %3149 = vmatpush3.msra.mxu1 %v1265_v1 }
 0xc19   :  { %3441 = vmatprep.subr.bf16.mxu1 %v3440_v60 }
 0xc1b   :  { %3151 = vmatmul.mubr.msk.f32.vlgmr.msra.gmra.mrb[8].mxu1 %vm62_vm0, %v2888_v14 }
 0xc1c   :  { %3443 = vmatpush3.bf16.msra.mxu1 %v3440_v60 }
 0xc1d   :  { %3445 = vmatprep.subr.bf16.mxu1 %v3444_v24 }
 0xc20   :  { %3447 = vmatpush3.bf16.msra.mxu1 %v3444_v24  ;;  %v1292_v24 = vld [vmem:[#allocation2 + $0x370] sm:$0xff] }
 0xc21   :  { %3449 = vmatprep.subr.bf16.mxu1 %v3448_v28 }
 0xc24   :  { %3451 = vmatpush3.bf16.msra.mxu1 %v3448_v28  ;;  %v1295_v28 = vld [vmem:[#allocation2 + $0x388] sm:$0xff] }
 0xc25   :  { %3453 = vmatprep.subr.bf16.mxu1 %v3452_v32 }
 0xc28   :  { %3455 = vmatpush3.bf16.msra.mxu1 %v3452_v32 }
 0xc29   :  { %3457 = vmatprep.subr.bf16.mxu1 %v3456_v34 }
 0xc2c   :  { %3459 = vmatpush3.bf16.msra.mxu1 %v3456_v34 }
 0xc2d   :  { %3461 = vmatprep.subr.bf16.mxu1 %v3460_v37 }
 0xc30   :  { %3463 = vmatpush3.bf16.msra.mxu1 %v3460_v37 }
 0xc31   :  { %3465 = vmatprep.subr.bf16.mxu1 %v3464_v40 }
 0xc34   :  { %3467 = vmatpush3.bf16.msra.mxu1 %v3464_v40 }
 0xc35   :  { %3469 = vmatprep.subr.bf16.mxu1 %v3468_v43 }
 0xc38   :  { %3471 = vmatpush3.bf16.msra.mxu1 %v3468_v43  ;;  %v1282_v43 = vld [vmem:[#allocation2 + $0x320] sm:$0xff] }
 0xc39   :  { %3611 = vmatprep.subr.bf16.mxu1 %v3472_v8 }
 0xcea   :  { %v3147_v44 = vpop.f32.mrb[6].mxu1 }
 0xceb   :  { %v1568_v45 = vmul.f32 %v3147_v44, %v3820_v2  ;;  %v1558_v46 = vpop.f32.mrb[7].mxu1  ;;  %v1283_v44 = vld [vmem:[#allocation2 + $0x328] sm:$0xff] }
 0xcec   :  { %v1567_v47 = vmul.f32 %v1558_v46, %v3822_v3  ;;  %v1285_v46 = vld [vmem:[#allocation2 + $0x338] sm:$0xff] }
 0xcee   :  { %v1569_v48 = vadd.f32 %v1568_v45, %v1567_v47  ;;  %v3152_v62 = vpop.f32.mrb[8].mxu1  ;;  %v1284_v45 = vld [vmem:[#allocation2 + $0x330] sm:$0xff]  ;;  %v1287_v47 = vld [vmem:[#allocation2 + $0x348] sm:$0xff] }
 0xcef   :  { %v1646_v63 = vpop.f32.mrb[9].mxu1 }
 0xcf0   :  { %v1570_v0 = vrot.slane %v1569_v48, 4 }
 0xcf2   :  { %v1571_v1 = vadd.f32 %v1570_v0, %v1569_v48  ;;  %v1288_v48 = vld [vmem:[#allocation2 + $0x350] sm:$0xff] }
 0xcf4   :  { %v1572_v4 = vrot.slane %v1571_v1, 2 }
 0xcf6   :  { %v1573_v58 = vadd.f32 %v1572_v4, %v1571_v1  ;;  %v1314_v1 = vld [vmem:[#allocation4 + $0x190] sm:$0xff]  ;;  %v1315_v4 = vld [vmem:[#allocation4 + $0x198] sm:$0xff] }
 0xcf8   :  { %v1574_v5 = vrot.slane %v1573_v58, 1 }
 0xcfa   :  { %v1575_v7 = vadd.f32 %v1574_v5, %v1573_v58  ;;  %v1316_v58 = vld [vmem:[#allocation4 + $0x1a0] sm:$0xff] }
 0xcfc   :  { %v1652_v9 = vadd.f32 %v3152_v62, %v1575_v7  ;;  %v1647_v10 = vadd.f32 %v1646_v63, %v1575_v7  ;;  %v1289_v62 = vld [vmem:[#allocation2 + $0x358] sm:$0xff] }
 0xcfe   :  { %v1658_v11 = vmul.f32 0.2, %v1652_v9  ;;  %v1657_v61 = vmul.f32 0.2, %v1647_v10  ;;  %vm1656_vm8 = vcmp.ge.f32.partialorder %v1652_v9, 0.0  ;;  %vm1655_vm9 = vcmp.ge.f32.partialorder %v1647_v10, 0.0 }
 0xd00   :  { %v1660_v8 = vsel %vm1656_vm8, %v1652_v9, %v1658_v11  ;;  %v1659_v2 = vsel %vm1655_vm9, %v1647_v10, %v1657_v61  ;;  %v1317_v11 = vld [vmem:[#allocation4 + $0x1a8] sm:$0xff] }
 0xd01   :  { %v1662_v12 = vadd.f32 %v1660_v8, %v3836_v29  ;;  %v1661_v3 = vadd.f32 %v1659_v2, %v3831_v25  ;;  %v1290_v25 = vld [vmem:[#allocation2 + $0x360] sm:$0xff]  ;;  %v1291_v29 = vld [vmem:[#allocation2 + $0x368] sm:$0xff] }
 0xd03   :  { %1665 = vmax.xlane.f32.xlu1 %v1662_v12  ;;  %1663 = vmax.xlane.f32.xlu0 %v1661_v3 }
 0xd90   :  { %v1666_v14 = vpop.xlane.xlu1 %1665  ;;  %v1664_v18 = vpop.xlane.xlu0 %1663 }
 0xd91   :  { %v1668_v19 = vsub.f32 %v1662_v12, %v1666_v14  ;;  %v1667_v20 = vsub.f32 %v1661_v3, %v1664_v18  ;;  %v1318_v18 = vld [vmem:[#allocation4 + $0x1b0] sm:$0xff] }
 0xd93   :  { %v1671_v60 = vmul.f32 1.442695, %v1668_v19  ;;  %v1669_v21 = vmul.f32 1.442695, %v1667_v20  ;;  %v1319_v19 = vld [vmem:[#allocation4 + $0x1b8] sm:$0xff]  ;;  %v1320_v20 = vld [vmem:[#allocation4 + $0x1c0] sm:$0xff] }
 0xd95   :  { %3636 = vpow2.f32 %v1671_v60 }
 0xd96   :  { %3638 = vpow2.f32 %v1669_v21 }
 0xd9f   :  { %v3892_v22 = vpop.eup %3636 }
 0xda0   :  { %v3894_v23 = vpop.eup %3638 }
 0xda1   :  { %3185 = vmatprep.mubr.f32.mxu1 %v3894_v23 }
 0xda2   :  { %3186 = vmatmul.mubr.f32.vlgmr.msra.gmra.mrb[10].mxu1 %v3892_v22 }
 0xda3   :  { %3612 = vmatpush1.bf16.msra.mxu1 %v3882_v6  ;;  %2001 = vmatprep.mubr.f32.mxu1 %v3699_v52 }
 0xda6   :  { %2758 = vmatmul.mubr.msk.f32.vlgmr.msra.gmra.mrb[12].mxu1 %vm148_vm1, %v1290_v25 }
 0xda7   :  { %2007 = vmatprep.mubr.f32.mxu1 %v3699_v52 }
 0xdaa   :  { %2759 = vmatmul.mubr.msk.f32.gmra.mrb[14].mxu1 %vm148_vm1, %v1291_v29 }
 0xdab   :  { %2013 = vmatprep.mubr.f32.mxu1 %v3699_v52 }
 0xdae   :  { %2760 = vmatmul.mubr.msk.f32.gmra.mrb[16].mxu1 %vm148_vm1, %v1292_v24  ;;  %v1321_v24 = vld [vmem:[#allocation4 + $0x1c8] sm:$0xff] }
 0xdaf   :  { %2019 = vmatprep.mubr.f32.mxu1 %v3699_v52 }
 0xdb2   :  { %2761 = vmatmul.mubr.msk.f32.gmra.mrb[18].mxu1 %vm148_vm1, %v1293_v26 }
 0xdb3   :  { %2025 = vmatprep.mubr.f32.mxu1 %v3699_v52 }
 0xdb6   :  { %2762 = vmatmul.mubr.msk.f32.gmra.mrb[20].mxu1 %vm148_vm1, %v1294_v27 }
 0xdb7   :  { %2031 = vmatprep.mubr.f32.mxu1 %v3699_v52 }
 0xdba   :  { %2763 = vmatmul.mubr.msk.f32.gmra.mrb[22].mxu1 %vm148_vm1, %v1295_v28 }
 0xdbb   :  { %2037 = vmatprep.mubr.f32.mxu1 %v3699_v52 }
 0xdbe   :  { %2764 = vmatmul.mubr.msk.f32.gmra.mrb[24].mxu1 %vm148_vm1, %v1296_v30 }
 0xdbf   :  { %2043 = vmatprep.mubr.f32.mxu1 %v3699_v52 }
 0xdc2   :  { %2765 = vmatmul.mubr.msk.f32.gmra.mrb[26].mxu1 %vm148_vm1, %v1297_v31 }
 0xdc3   :  { %2157 = vmatprep.mubr.f32.mxu1 %v3699_v52 }
 0xe75   :  { %v3187_v32 = vpop.f32.mrb[10].mxu1 }
 0xe76   :  { %v1749_v54 = vmax.f32 %v3187_v32, 1e-30  ;;  %v1739_v33 = vpop.f32.mrb[11].mxu1 }
 0xe77   :  { %v1748_v34 = vmax.f32 %v1739_v33, 1e-30  ;;  %v1323_v33 = vld [vmem:[#allocation4 + $0x1d8] sm:$0xff] }
 0xe78   :  { %3640 = vrcp.f32 %v1749_v54 }
 0xe79   :  { %3642 = vrcp.f32 %v1748_v34  ;;  %v2003_v63 = vpop.f32.mrb[12].mxu1 }
 0xe7a   :  { %v2005_v0 = vpop.f32.mrb[13].mxu1  ;;  %v3935_v7 = vmul.f32 %v2003_v63, %v1314_v1  ;;  %v1329_v1 = vld [vmem:[#allocation4 + $0x208] sm:$0xff] }
 0xe7b   :  { %v3937_v9 = vmul.f32 %v2005_v0, %v1315_v4 }
 0xe7d   :  { %v2009_v5 = vpop.f32.mrb[14].mxu1 }
 0xe7e   :  { %v3939_v10 = vmul.f32 %v2009_v5, %v1316_v58  ;;  %v2011_v61 = vpop.f32.mrb[15].mxu1 }
 0xe7f   :  { %v3941_v8 = vmul.f32 %v2011_v61, %v1317_v11  ;;  %v2439_v61 = vld [vmem:[#allocation2 + $0x4e0] sm:$0xff] }
 0xe80   :  { %v3494_v2 = vpack.c.bf16 %v3939_v10, %v3935_v7  ;;  %v2179_v10 = vld [vmem:[#allocation2 + $0x3d8] sm:$0xff] }
 0xe81   :  { %v3492_v12 = vpack.c.bf16 %v3941_v8, %v3937_v9  ;;  %v2015_v3 = vpop.f32.mrb[16].mxu1  ;;  %v2178_v9 = vld [vmem:[#allocation2 + $0x3d0] sm:$0xff] }
 0xe82   :  { %v3641_v35 = vpop.eup %3640  ;;  %v2017_v14 = vpop.f32.mrb[17].mxu1  ;;  %v3947_v21 = vmul.f32 %v2015_v3, %v1318_v18  ;;  %v2440_v3 = vld [vmem:[#allocation2 + $0x4e8] sm:$0xff] }
 0xe83   :  { %v3643_v36 = vpop.eup %3642  ;;  %v1753_v37 = vmul.f32 %v3641_v35, %v1749_v54  ;;  %v3949_v25 = vmul.f32 %v2017_v14, %v1319_v19  ;;  %v1322_v54 = vld [vmem:[#allocation4 + $0x1d0] sm:$0xff]  ;;  %v3552_v18 = vpack.c.bf16 %v2440_v3, %v2439_v61  ;;  %v2424_v19 = vld [vmem:[#allocation2 + $0x468] sm:$0xff] }
 0xe84   :  { %v1752_v38 = vmul.f32 %v3643_v36, %v1748_v34  ;;  %v1324_v34 = vld [vmem:[#allocation4 + $0x1e0] sm:$0xff]  ;;  %v2423_v14 = vld [vmem:[#allocation2 + $0x460] sm:$0xff] }
 0xe85   :  { %v1755_v39 = vsub.f32 2.0, %v1753_v37  ;;  %v2021_v60 = vpop.f32.mrb[18].mxu1 }
 0xe86   :  { %v1754_v40 = vsub.f32 2.0, %v1752_v38  ;;  %v3951_v29 = vmul.f32 %v2021_v60, %v1320_v20  ;;  %v2023_v26 = vpop.f32.mrb[19].mxu1  ;;  %v2441_v20 = vld [vmem:[#allocation2 + $0x4f0] sm:$0xff]  ;;  %v2442_v60 = vld [vmem:[#allocation2 + $0x4f8] sm:$0xff] }
 0xe87   :  { %v1757_v42 = vmul.f32 %v3641_v35, %v1755_v39  ;;  %v3953_v27 = vmul.f32 %v2023_v26, %v1321_v24  ;;  %v1325_v39 = vld [vmem:[#allocation4 + $0x1e8] sm:$0xff]  ;;  %v3554_v24 = vpack.c.bf16 %v2424_v19, %v2423_v14  ;;  %v3556_v26 = vpack.c.bf16 %v2442_v60, %v2441_v20  ;;  %v2431_v14 = vld [vmem:[#allocation2 + $0x4a0] sm:$0xff]  ;;  %v2449_v19 = vld [vmem:[#allocation2 + $0x530] sm:$0xff] }
 0xe88   :  { %v1756_v41 = vmul.f32 %v3643_v36, %v1754_v40  ;;  %v3498_v28 = vpack.c.bf16 %v3951_v29, %v3947_v21  ;;  %v2450_v20 = vld [vmem:[#allocation2 + $0x538] sm:$0xff] }
 0xe89   :  { %v3496_v30 = vpack.c.bf16 %v3953_v27, %v3949_v25  ;;  %v2027_v31 = vpop.f32.mrb[20].mxu1  ;;  %v2175_v21 = vld [vmem:[#allocation2 + $0x3b8] sm:$0xff]  ;;  %v2330_v27 = vld [vmem:[#allocation2 + $0x3e0] sm:$0xff] }
 0xe8a   :  { %3190 = vmatprep.mubr.msk.f32.mxu0 %vm62_vm0, %v1756_v41  ;;  %v2029_v32 = vpop.f32.mrb[21].mxu1  ;;  %v3959_v36 = vmul.f32 %v2027_v31, %v1322_v54  ;;  %v2425_v31 = vld [vmem:[#allocation2 + $0x470] sm:$0xff]  ;;  %v2443_v54 = vld [vmem:[#allocation2 + $0x500] sm:$0xff] }
 0xe8b   :  { %3191 = vmatmul.mubr.msk.f32.vlgmr.msra.gmra.mrb[32].mxu0 %vm62_vm0, %v1757_v42  ;;  %v3961_v37 = vmul.f32 %v2029_v32, %v1323_v33  ;;  %v2426_v32 = vld [vmem:[#allocation2 + $0x478] sm:$0xff]  ;;  %v2444_v33 = vld [vmem:[#allocation2 + $0x508] sm:$0xff] }
 0xe8c   :  { %3475 = vmatpush1.bf16.msra.mxu0 %v3882_v6  ;;  %1953 = vmatprep.mubr.f32.mxu0 %v3699_v52  ;;  %v1286_v6 = vld [vmem:[#allocation2 + $0x340] sm:$0xff] }
 0xe8d   :  { %v2033_v35 = vpop.f32.mrb[22].mxu1  ;;  %3553 = vmatprep.subr.bf16.mxu0 %v3552_v18  ;;  %v2432_v18 = vld [vmem:[#allocation2 + $0x4a8] sm:$0xff] }
 0xe8e   :  { %v3963_v38 = vmul.f32 %v2033_v35, %v1324_v34  ;;  %v2035_v40 = vpop.f32.mrb[23].mxu1  ;;  %v3558_v34 = vpack.c.bf16 %v2426_v32, %v2425_v31  ;;  %v3560_v35 = vpack.c.bf16 %v2444_v33, %v2443_v54  ;;  %v3570_v60 = vpack.c.bf16 %v2432_v18, %v2431_v14  ;;  %v2434_v31 = vld [vmem:[#allocation2 + $0x4b8] sm:$0xff]  ;;  %v2451_v32 = vld [vmem:[#allocation2 + $0x540] sm:$0xff]  ;;  %v2452_v54 = vld [vmem:[#allocation2 + $0x548] sm:$0xff] }
 0xe8f   :  { %2750 = vmatmul.mubr.msk.f32.vlgmr.msra.gmra.mrb[34].mxu0 %vm148_vm1, %v1282_v43  ;;  %v3965_v41 = vmul.f32 %v2035_v40, %v1325_v39  ;;  %v2427_v39 = vld [vmem:[#allocation2 + $0x480] sm:$0xff]  ;;  %v2428_v40 = vld [vmem:[#allocation2 + $0x488] sm:$0xff] }
 0xe90   :  { %1959 = vmatprep.mubr.f32.mxu0 %v3699_v52  ;;  %v3502_v42 = vpack.c.bf16 %v3963_v38, %v3959_v36  ;;  %3555 = vmatpush3.bf16.msra.mxu0 %v3554_v24  ;;  %v3572_v24 = vpack.c.bf16 %v2450_v20, %v2449_v19  ;;  %v2335_v38 = vld [vmem:[#allocation2 + $0x408] sm:$0xff] }
 0xe91   :  { %v3500_v43 = vpack.c.bf16 %v3965_v41, %v3961_v37  ;;  %3557 = vmatprep.subr.bf16.mxu0 %v3556_v26  ;;  %v2433_v26 = vld [vmem:[#allocation2 + $0x4b0] sm:$0xff]  ;;  %v2334_v37 = vld [vmem:[#allocation2 + $0x400] sm:$0xff]  ;;  %v2339_v41 = vld [vmem:[#allocation2 + $0x428] sm:$0xff] }
 0xe92   :  { %v3574_v33 = vpack.c.bf16 %v2434_v31, %v2433_v26  ;;  %v1304_v26 = vld [vmem:[#allocation4 + $0x140] sm:$0xff]  ;;  %v1303_v31 = vld [vmem:[#allocation4 + $0x138] sm:$0xff]  ;;  %v3528_v55 = vpack.c.bf16 %v2335_v38, %v2334_v37  ;;  %v2613_v38 = vld [vmem:[#allocation2 + $0x578] sm:$0xff] }
 0xe93   :  { %2751 = vmatmul.mubr.msk.f32.gmra.mrb[36].mxu0 %vm148_vm1, %v1283_v44  ;;  %v1326_v44 = vld [vmem:[#allocation4 + $0x1f0] sm:$0xff] }
 0xe94   :  { %1965 = vmatprep.mubr.f32.mxu0 %v3699_v52  ;;  %3559 = vmatpush3.bf16.msra.mxu0 %v3558_v34  ;;  %v3576_v34 = vpack.c.bf16 %v2452_v54, %v2451_v32  ;;  %v1305_v32 = vld [vmem:[#allocation4 + $0x148] sm:$0xff] }
 0xe95   :  { %3561 = vmatprep.subr.bf16.mxu0 %v3560_v35 }
 0xe97   :  { %2752 = vmatmul.mubr.msk.f32.gmra.mrb[38].mxu0 %vm148_vm1, %v1284_v45  ;;  %v2039_v45 = vpop.f32.mrb[24].mxu1 }
 0xe98   :  { %1971 = vmatprep.mubr.f32.mxu0 %v3699_v52 }
 0xe9b   :  { %2753 = vmatmul.mubr.msk.f32.gmra.mrb[40].mxu0 %vm148_vm1, %v1285_v46  ;;  %v1327_v46 = vld [vmem:[#allocation4 + $0x1f8] sm:$0xff] }
 0xe9c   :  { %1977 = vmatprep.mubr.f32.mxu0 %v3699_v52 }
 0xe9f   :  { %2754 = vmatmul.mubr.msk.f32.gmra.mrb[42].mxu0 %vm148_vm1, %v1286_v6  ;;  %v1328_v6 = vld [vmem:[#allocation4 + $0x200] sm:$0xff] }
 0xea0   :  { %1983 = vmatprep.mubr.f32.mxu0 %v3699_v52 }
 0xea3   :  { %2755 = vmatmul.mubr.msk.f32.gmra.mrb[44].mxu0 %vm148_vm1, %v1287_v47  ;;  %v3971_v47 = vmul.f32 %v2039_v45, %v1326_v44  ;;  %v2445_v44 = vld [vmem:[#allocation2 + $0x510] sm:$0xff]  ;;  %v2446_v45 = vld [vmem:[#allocation2 + $0x518] sm:$0xff] }
 0xea4   :  { %1989 = vmatprep.mubr.f32.mxu0 %v3699_v52 }
 0xea7   :  { %2756 = vmatmul.mubr.msk.f32.gmra.mrb[46].mxu0 %vm148_vm1, %v1288_v48  ;;  %v2041_v48 = vpop.f32.mrb[25].mxu1 }
 0xea8   :  { %1995 = vmatprep.mubr.f32.mxu0 %v3699_v52  ;;  %v2045_v63 = vpop.f32.mrb[26].mxu1 }
 0xea9   :  { %v3975_v0 = vmul.f32 %v2045_v63, %v1328_v6  ;;  %v2047_v4 = vpop.f32.mrb[27].mxu1  ;;  %v3564_v6 = vpack.c.bf16 %v2446_v45, %v2445_v44  ;;  %v2430_v63 = vld [vmem:[#allocation2 + $0x498] sm:$0xff]  ;;  %v1298_v45 = vld [vmem:[#allocation4 + $0x110] sm:$0xff] }
 0xeaa   :  { %v3977_v58 = vmul.f32 %v2047_v4, %v1329_v1  ;;  %v2447_v1 = vld [vmem:[#allocation2 + $0x520] sm:$0xff]  ;;  %v2448_v4 = vld [vmem:[#allocation2 + $0x528] sm:$0xff] }
 0xeab   :  { %2757 = vmatmul.mubr.msk.f32.gmra.mrb[48].mxu0 %vm148_vm1, %v1289_v62  ;;  %v3973_v62 = vmul.f32 %v2041_v48, %v1327_v46  ;;  %v3506_v5 = vpack.c.bf16 %v3975_v0, %v3971_v47  ;;  %v3562_v46 = vpack.c.bf16 %v2428_v40, %v2427_v39  ;;  %v2429_v48 = vld [vmem:[#allocation2 + $0x490] sm:$0xff]  ;;  %v3568_v3 = vpack.c.bf16 %v2448_v4, %v2447_v1  ;;  %v2342_v47 = vld [vmem:[#allocation2 + $0x440] sm:$0xff] }
 0xeac   :  { %v3566_v61 = vpack.c.bf16 %v2430_v63, %v2429_v48  ;;  %v1301_v48 = vld [vmem:[#allocation4 + $0x128] sm:$0xff]  ;;  %v2344_v0 = vld [vmem:[#allocation2 + $0x450] sm:$0xff] }
 0xead   :  { %v3504_v11 = vpack.c.bf16 %v3977_v58, %v3973_v62  ;;  %3563 = vmatpush3.bf16.msra.mxu0 %v3562_v46  ;;  %v1300_v46 = vld [vmem:[#allocation4 + $0x120] sm:$0xff]  ;;  %v3544_v62 = vpack.c.bf16 %v2343_v49, %v2342_v47  ;;  %v2345_v58 = vld [vmem:[#allocation2 + $0x458] sm:$0xff]  ;;  %v2622_v49 = vld [vmem:[#allocation2 + $0x5c0] sm:$0xff] }
 0xeae   :  { %3565 = vmatprep.subr.bf16.mxu0 %v3564_v6  ;;  %v1299_v6 = vld [vmem:[#allocation4 + $0x118] sm:$0xff]  ;;  %v2621_v47 = vld [vmem:[#allocation2 + $0x5b8] sm:$0xff] }
 0xeb1   :  { %3567 = vmatpush3.bf16.msra.mxu0 %v3566_v61 }
 0xeb2   :  { %3569 = vmatprep.subr.bf16.mxu0 %v3568_v3 }
 0xeb5   :  { %3571 = vmatpush3.bf16.msra.mxu0 %v3570_v60 }
 0xeb6   :  { %3573 = vmatprep.subr.bf16.mxu0 %v3572_v24  ;;  %v1302_v24 = vld [vmem:[#allocation4 + $0x130] sm:$0xff] }
 0xeb9   :  { %3575 = vmatpush3.bf16.msra.mxu0 %v3574_v33 }
 0xeba   :  { %3577 = vmatprep.subr.bf16.mxu0 %v3576_v34 }
 0xf5e   :  { %v3983_v35 = vpop.f32.mrb[32].mxu0 }
 0xf5f   :  { %v3985_v39 = vpop.f32.mrb[33].mxu0  ;;  %v1840_v25 = vmul.f32 %v3892_v22, %v3983_v35  ;;  %v2332_v22 = vld [vmem:[#allocation2 + $0x3f0] sm:$0xff]  ;;  %v2435_v35 = vld [vmem:[#allocation2 + $0x4c0] sm:$0xff] }
 0xf60   :  { %v1839_v8 = vmul.f32 %v3894_v23, %v3985_v39  ;;  %v2436_v39 = vld [vmem:[#allocation2 + $0x4c8] sm:$0xff] }
 0xf62   :  { %v1955_v40 = vpop.f32.mrb[34].mxu0 }
 0xf63   :  { %v1957_v44 = vpop.f32.mrb[35].mxu0  ;;  %v2050_v1 = vmul.f32 %v1955_v40, %v1298_v45 }
 0xf64   :  { %v2051_v3 = vmul.f32 %v1957_v44, %v1299_v6 }
 0xf66   :  { %v1961_v63 = vpop.f32.mrb[36].mxu0 }
 0xf67   :  { %v2052_v4 = vmul.f32 %v1961_v63, %v1300_v46  ;;  %v1963_v61 = vpop.f32.mrb[37].mxu0  ;;  %v1308_v63 = vld [vmem:[#allocation4 + $0x160] sm:$0xff] }
 0xf68   :  { %v2053_v14 = vmul.f32 %v1963_v61, %v1301_v48  ;;  %v1306_v48 = vld [vmem:[#allocation4 + $0x150] sm:$0xff] }
 0xf69   :  { %v3478_v18 = vpack.c.bf16 %v2052_v4, %v2050_v1  ;;  %v1307_v1 = vld [vmem:[#allocation4 + $0x158] sm:$0xff]  ;;  %v1309_v4 = vld [vmem:[#allocation4 + $0x168] sm:$0xff] }
 0xf6a   :  { %v3476_v19 = vpack.c.bf16 %v2053_v14, %v2051_v3  ;;  %v1967_v20 = vpop.f32.mrb[38].mxu0 }
 0xf6b   :  { %v1969_v60 = vpop.f32.mrb[39].mxu0  ;;  %v2054_v33 = vmul.f32 %v1967_v20, %v1302_v24 }
 0xf6c   :  { %3477 = vmatprep.subr.bf16.mxu1 %v3476_v19  ;;  %v2055_v51 = vmul.f32 %v1969_v60, %v1303_v31  ;;  %v1310_v31 = vld [vmem:[#allocation4 + $0x170] sm:$0xff] }
 0xf6d   :  { %3479 = vmatpush1.bf16.msra.mxu1 %v3478_v18 }
 0xf6e   :  { %v1973_v54 = vpop.f32.mrb[40].mxu0 }
 0xf6f   :  { %v2056_v34 = vmul.f32 %v1973_v54, %v1304_v26  ;;  %v1975_v59 = vpop.f32.mrb[41].mxu0  ;;  %v1313_v54 = vld [vmem:[#allocation4 + $0x188] sm:$0xff] }
 0xf70   :  { %v2057_v40 = vmul.f32 %v1975_v59, %v1305_v32  ;;  %v1311_v32 = vld [vmem:[#allocation4 + $0x178] sm:$0xff] }
 0xf71   :  { %v3482_v45 = vpack.c.bf16 %v2056_v34, %v2054_v33 }
 0xf72   :  { %v3480_v46 = vpack.c.bf16 %v2057_v40, %v2055_v51  ;;  %v1979_v44 = vpop.f32.mrb[42].mxu0  ;;  %v1312_v51 = vld [vmem:[#allocation4 + $0x180] sm:$0xff] }
 0xf73   :  { %v1981_v6 = vpop.f32.mrb[43].mxu0  ;;  %v2058_v3 = vmul.f32 %v1979_v44, %v1306_v48 }
 0xf74   :  { %3481 = vmatprep.subr.bf16.mxu1 %v3480_v46  ;;  %v2059_v19 = vmul.f32 %v1981_v6, %v1307_v1  ;;  %v2176_v6 = vld [vmem:[#allocation2 + $0x3c0] sm:$0xff]  ;;  %v2177_v1 = vld [vmem:[#allocation2 + $0x3c8] sm:$0xff] }
 0xf75   :  { %3483 = vmatpush1.bf16.msra.mxu1 %v3482_v45  ;;  %v3508_v7 = vpack.c.bf16 %v2177_v1, %v2176_v6 }
 0xf76   :  { %v1985_v61 = vpop.f32.mrb[44].mxu0 }
 0xf77   :  { %v2060_v14 = vmul.f32 %v1985_v61, %v1308_v63  ;;  %v1987_v18 = vpop.f32.mrb[45].mxu0  ;;  %v2453_v61 = vld [vmem:[#allocation2 + $0x550] sm:$0xff] }
 0xf78   :  { %v2061_v20 = vmul.f32 %v1987_v18, %v1309_v4  ;;  %v3578_v4 = vpack.c.bf16 %v2436_v39, %v2435_v35  ;;  %v2437_v18 = vld [vmem:[#allocation2 + $0x4d0] sm:$0xff]  ;;  %v2770_v39 = vld [vmem:[#allocation2 + $0x560] ss:$0 sm:$0xff] }
 0xf79   :  { %v3486_v24 = vpack.c.bf16 %v2060_v14, %v2058_v3  ;;  %v2454_v3 = vld [vmem:[#allocation2 + $0x558] sm:$0xff] }
 0xf7a   :  { %v3484_v26 = vpack.c.bf16 %v2061_v20, %v2059_v19  ;;  %v1991_v60 = vpop.f32.mrb[46].mxu0  ;;  %3579 = vmatpush3.bf16.msra.mxu0 %v3578_v4  ;;  %v3580_v14 = vpack.c.bf16 %v2454_v3, %v2453_v61  ;;  %v2438_v19 = vld [vmem:[#allocation2 + $0x4d8] sm:$0xff] }
 0xf7b   :  { %v1993_v59 = vpop.f32.mrb[47].mxu0  ;;  %v2062_v34 = vmul.f32 %v1991_v60, %v1310_v31  ;;  %v3582_v20 = vpack.c.bf16 %v2438_v19, %v2437_v18  ;;  %v2772_v18 = vld [vmem:[#allocation2 + $0x5e8] ss:$0 sm:$0xff] }
 0xf7c   :  { %3485 = vmatprep.subr.bf16.mxu1 %v3484_v26  ;;  %v2063_v46 = vmul.f32 %v1993_v59, %v1311_v32  ;;  %3581 = vmatprep.subr.bf16.mxu0 %v3580_v14  ;;  %v1264_v59 = vld [vmem:[#allocation4 + $0x100] ss:$8 sm:$0x3] }
 0xf7d   :  { %3487 = vmatpush1.bf16.msra.mxu1 %v3486_v24  ;;  %v2083_v24 = vlaneseq }
 0xf7e   :  { %v1997_v33 = vpop.f32.mrb[48].mxu0  ;;  %3583 = vmatpush3.bf16.msra.mxu0 %v3582_v20 }
 0xf7f   :  { %v2064_v40 = vmul.f32 %v1997_v33, %v1312_v51  ;;  %v1999_v45 = vpop.f32.mrb[49].mxu0  ;;  %v2084_v26 = vshrl.u32 %v2083_v24, 7 }
 0xf80   :  { %v2065_v44 = vmul.f32 %v1999_v45, %v1313_v54 }
 0xf81   :  { %v3490_v48 = vpack.c.bf16 %v2064_v40, %v2062_v34  ;;  %v2085_v60 = vsub.s32 0, %v2084_v26  ;;  %v2089_v31 = vsub.s32 1, %v2084_v26 }
 0xf82   :  { %v3488_v63 = vpack.c.bf16 %v2065_v44, %v2063_v46 }
 0xf83   :  { %v2086_v51 = vrot.slane %v1264_v59, %v2085_v60 }
 0xf84   :  { %3489 = vmatprep.subr.bf16.mxu1 %v3488_v63 }
 0xf85   :  { %3491 = vmatpush1.bf16.msra.mxu1 %v3490_v48 }
 0xf86   :  { %3493 = vmatprep.subr.bf16.mxu1 %v3492_v12  ;;  %v2174_v12 = vld [vmem:[#allocation2 + $0x3b0] sm:$0xff] }
 0xf87   :  { %v3516_v29 = vpack.c.bf16 %v2175_v21, %v2174_v12 }
 0xf89   :  { %3495 = vmatpush1.bf16.msra.mxu1 %v3494_v2  ;;  %v3512_v2 = vpack.c.bf16 %v2179_v10, %v2178_v9  ;;  %v3701_v10 = vmov 0.0|0.0  }
 0xf8a   :  { %3497 = vmatprep.subr.bf16.mxu1 %v3496_v30  ;;  %v2333_v30 = vld [vmem:[#allocation2 + $0x3f8] sm:$0xff]  ;;  %3584 = vmatprep.subr.bf16.mxu0 %v3701_v10 }
 0xf8b   :  { %v3524_v36 = vpack.c.bf16 %v2333_v30, %v2332_v22  ;;  %v2612_v22 = vld [vmem:[#allocation2 + $0x570] sm:$0xff] }
 0xf8d   :  { %3499 = vmatpush1.bf16.msra.mxu1 %v3498_v28  ;;  %v2331_v28 = vld [vmem:[#allocation2 + $0x3e8] sm:$0xff] }
 0xf8e   :  { %3501 = vmatprep.subr.bf16.mxu1 %v3500_v43  ;;  %v3520_v23 = vpack.c.bf16 %v2331_v28, %v2330_v27  ;;  %v2340_v43 = vld [vmem:[#allocation2 + $0x430] sm:$0xff] }
 0xf91   :  { %3503 = vmatpush1.bf16.msra.mxu1 %v3502_v42 }
 0xf92   :  { %3505 = vmatprep.subr.bf16.mxu1 %v3504_v11  ;;  %v4053_v11 = vmax.f32 %v3873_v50, 0.0  ;;  %v2090_v50 = vrot.slane %v1264_v59, %v2089_v31 }
 0xf95   :  { %3507 = vmatpush1.bf16.msra.mxu1 %v3506_v5  ;;  %v3548_v5 = vpack.c.bf16 %v2345_v58, %v2344_v0  ;;  %v2624_v0 = vld [vmem:[#allocation2 + $0x5d0] sm:$0xff] }
 0xf96   :  { %3509 = vmatprep.subr.bf16.mxu1 %v3508_v7 }
 0xf98   :  { %2158 = vmatmul.mubr.f32.vlgmr.msra.gmra.mrb[28].mxu1 %v1839_v8 }
 0xf99   :  { %3511 = vmatpush3.bf16.msra.mxu1 %v3508_v7  ;;  %2163 = vmatprep.mubr.f32.mxu1 %v3699_v52 }
 0xf9a   :  { %3513 = vmatprep.subr.bf16.mxu1 %v3512_v2 }
 0xf9c   :  { %2164 = vmatmul.mubr.f32.gmra.mrb[30].mxu1 %v1840_v25 }
 0xf9d   :  { %3515 = vmatpush3.bf16.msra.mxu1 %v3512_v2  ;;  %3201 = vmatprep.mubr.msk.f32.mxu1 %vm443_vm2, %v395_v56  ;;  %v2337_v56 = vld [vmem:[#allocation2 + $0x418] sm:$0xff] }
 0xf9e   :  { %3517 = vmatprep.subr.bf16.mxu1 %v3516_v29 }
 0xfa0   :  { %3202 = vmatmul.mubr.msk.f32.vlgmr.msra.gmra.mrb[32].mxu1 %vm443_vm2, %v396_v57  ;;  %v2338_v57 = vld [vmem:[#allocation2 + $0x420] sm:$0xff] }
 0xfa1   :  { %3208 = vmatprep.mubr.msk.f32.mxu1 %vm148_vm1, %v230_v16  ;;  %3519 = vmatpush3.bf16.msra.mxu1 %v3516_v29  ;;  %v3532_v16 = vpack.c.bf16 %v2337_v56, %v2336_v15  ;;  %v3536_v42 = vpack.c.bf16 %v2339_v41, %v2338_v57  ;;  %v2615_v15 = vld [vmem:[#allocation2 + $0x588] sm:$0xff]  ;;  %v2616_v56 = vld [vmem:[#allocation2 + $0x590] sm:$0xff]  ;;  %v2617_v57 = vld [vmem:[#allocation2 + $0x598] sm:$0xff] }
 0xfa2   :  { %3521 = vmatprep.subr.bf16.mxu1 %v3520_v23  ;;  %v2618_v41 = vld [vmem:[#allocation2 + $0x5a0] sm:$0xff] }
 0xfa8   :  { %3209 = vmatmul.mubr.msk.f32.vlgmr.msra.gmra.mrb[32].mxu1 %vm148_vm1, %v231_v17  ;;  %v3540_v17 = vpack.c.bf16 %v2341_v13, %v2340_v43  ;;  %v2619_v43 = vld [vmem:[#allocation2 + $0x5a8] sm:$0xff]  ;;  %v2620_v13 = vld [vmem:[#allocation2 + $0x5b0] sm:$0xff] }
 0xfa9   :  { %3523 = vmatpush3.bf16.msra.mxu1 %v3520_v23  ;;  %3243 = vmatprep.mubr.f32.mxu1 %v4052_v53  ;;  %v2611_v23 = vld [vmem:[#allocation2 + $0x568] sm:$0xff]  ;;  %v2614_v53 = vld [vmem:[#allocation2 + $0x580] sm:$0xff] }
 0xfaa   :  { %3525 = vmatprep.subr.bf16.mxu1 %v3524_v36  ;;  %v3588_v37 = vpack.c.bf16 %v2612_v22, %v2611_v23 }
 0xfad   :  { %3527 = vmatpush3.bf16.msra.mxu1 %v3524_v36  ;;  %v57_v36 = vld [vmem:[%s4046_s3] sm:$0x3] }
 0xfae   :  { %3529 = vmatprep.subr.bf16.mxu1 %v3528_v55 }
 0xfb1   :  { %3531 = vmatpush3.bf16.msra.mxu1 %v3528_v55  ;;  %v3591_v55 = vpack.c.bf16 %v2614_v53, %v2613_v38 }
 0xfb2   :  { %3533 = vmatprep.subr.bf16.mxu1 %v3532_v16 }
 0xfb5   :  { %3535 = vmatpush3.bf16.msra.mxu1 %v3532_v16  ;;  %v3594_v16 = vpack.c.bf16 %v2616_v56, %v2615_v15 }
 0xfb6   :  { %3537 = vmatprep.subr.bf16.mxu1 %v3536_v42 }
 0xfb9   :  { %3539 = vmatpush3.bf16.msra.mxu1 %v3536_v42  ;;  %v3597_v42 = vpack.c.bf16 %v2618_v41, %v2617_v57 }
 0xfba   :  { %3541 = vmatprep.subr.bf16.mxu1 %v3540_v17 }
 0xfbd   :  { %3543 = vmatpush3.bf16.msra.mxu1 %v3540_v17  ;;  %v3600_v17 = vpack.c.bf16 %v2620_v13, %v2619_v43 }
 0xfbe   :  { %3545 = vmatprep.subr.bf16.mxu1 %v3544_v62 }
 0xfc1   :  { %3547 = vmatpush3.bf16.msra.mxu1 %v3544_v62  ;;  %v2623_v62 = vld [vmem:[#allocation2 + $0x5c8] sm:$0xff] }
 0xfc2   :  { %3549 = vmatprep.subr.bf16.mxu1 %v3548_v5  ;;  %v3606_v58 = vpack.c.bf16 %v2624_v0, %v2623_v62 }
 0xfc5   :  { %3551 = vmatpush3.bf16.msra.mxu1 %v3548_v5  ;;  %v2625_v5 = vld [vmem:[#allocation2 + $0x5d8] sm:$0xff] }
 0xfc8   :  { %3244 = vmatmul.mubr.f32.vlgmr.msra.gmra.mrb[32].mxu1 %v4053_v11  ;;  %v2626_v11 = vld [vmem:[#allocation2 + $0x5e0] sm:$0xff] }
 0xfc9   :  { %v3609_v35 = vpack.c.bf16 %v2626_v11, %v2625_v5 }
0x106b   :  { %v2159_v32 = vpop.f32.mrb[28].mxu1 }
0x106c   :  { %v2160_v54 = vadd.f32 %v2159_v32, %v2086_v51  ;;  %v2161_v33 = vpop.f32.mrb[29].mxu1 }
0x106d   :  { %v2162_v34 = vadd.f32 %v2161_v33, %v2090_v50 }
0x106e   :  { %v2170_v46 = vmax.f32 %v2160_v54, 0.0 }
0x106f   :  { %v2171_v40 = vmax.f32 %v2162_v34, 0.0  ;;  %v2165_v45 = vpop.f32.mrb[30].mxu1 }
0x1070   :  { %v2166_v44 = vadd.f32 %v2165_v45, %v2086_v51  ;;  %v2167_v48 = vpop.f32.mrb[31].mxu1 }
0x1071   :  { %v2168_v63 = vadd.f32 %v2167_v48, %v2090_v50  ;;  %2519 = vmatprep.mubr.f32.mxu0 %v2171_v40 }
0x1072   :  { %2520 = vmatmul.mubr.f32.vlgmr.msra.gmra.mrb[50].mxu0 %v2170_v46  ;;  %v2172_v1 = vmax.f32 %v2166_v44, 0.0 }
0x1073   :  { %v2173_v6 = vmax.f32 %v2168_v63, 0.0 }
0x1075   :  { %2524 = vmatprep.mubr.f32.mxu0 %v2173_v6 }
0x1076   :  { %2525 = vmatmul.mubr.f32.gmra.mrb[52].mxu0 %v2172_v1 }
0x1077   :  { %3250 = vmatprep.mubr.msk.f32.mxu0 %vm3702_vm10, %v3699_v52 }
0x109b   :  { %v3245_v7 = vpop.f32.mrb[32].mxu1 }
0x109c   :  { %v2412_v9 = vpop.f32.mrb[33].mxu1 }
0x1145   :  { %v2976_v8 = vpop.f32.mrb[50].mxu0 }
0x1146   :  { %v2977_v2 = vpop.f32.mrb[51].mxu0 }
0x1147   :  { %v2978_v12 = vadd.f32 %v2977_v2, %v2976_v8 }
0x1149   :  { %v2530_v21 = vadd.f32 %v2978_v12, %v2412_v9  ;;  %v2979_v25 = vpop.f32.mrb[52].mxu0 }
0x114a   :  { %v2980_v29 = vpop.f32.mrb[53].mxu0 }
0x114b   :  { %v2981_v27 = vadd.f32 %v2980_v29, %v2979_v25 }
0x114d   :  { %v2531_v28 = vadd.f32 %v3245_v7, %v2981_v27 }
0x114f   :  { %v3585_v30 = vpack.c.bf16 %v2531_v28, %v2530_v21 }
0x1151   :  { %3586 = vmatpush3.bf16.msra.mxu0 %v3585_v30 }
0x1152   :  { %3587 = vmatprep.subr.bf16.mxu0 %v3701_v10 }
0x1154   :  { %3251 = vmatmul.mubr.msk.f32.vlgmr.msra.gmra.mrb[54].mxu0 %vm148_vm1, %v57_v36 }
0x1155   :  { %3589 = vmatpush3.bf16.msra.mxu0 %v3588_v37  ;;  %3285 = vmatprep.mubr.msk.f32.mxu0 %vm3702_vm10, %v3699_v52  ;;  %v3603_v52 = vpack.c.bf16 %v2622_v49, %v2621_v47 }
0x1156   :  { %3590 = vmatprep.subr.bf16.mxu0 %v3701_v10 }
0x1159   :  { %3592 = vmatpush3.bf16.msra.mxu0 %v3591_v55 }
0x115a   :  { %3593 = vmatprep.subr.bf16.mxu0 %v3701_v10 }
0x115d   :  { %3595 = vmatpush3.bf16.msra.mxu0 %v3594_v16 }
0x115e   :  { %3596 = vmatprep.subr.bf16.mxu0 %v3701_v10 }
0x1161   :  { %3598 = vmatpush3.bf16.msra.mxu0 %v3597_v42 }
0x1162   :  { %3599 = vmatprep.subr.bf16.mxu0 %v3701_v10 }
0x1165   :  { %3601 = vmatpush3.bf16.msra.mxu0 %v3600_v17 }
0x1166   :  { %3602 = vmatprep.subr.bf16.mxu0 %v3701_v10 }
0x1169   :  { %3604 = vmatpush3.bf16.msra.mxu0 %v3603_v52 }
0x116a   :  { %3605 = vmatprep.subr.bf16.mxu0 %v3701_v10 }
0x116d   :  { %3607 = vmatpush3.bf16.msra.mxu0 %v3606_v58 }
0x116e   :  { %3608 = vmatprep.subr.bf16.mxu0 %v3701_v10 }
0x1171   :  { %3610 = vmatpush3.bf16.msra.mxu0 %v3609_v35 }
0x1227   :  { %v2606_v4 = vpop.f32.mrb[54].mxu0 }
0x1228   :  { %v2607_v61 = vadd.f32 %v2770_v39, %v2606_v4  ;;  %v3252_v3 = vpop.f32.mrb[55].mxu0 }
0x122a   :  { %v2610_v14 = vmax.f32 %v2607_v61, 0.0 }
0x122c   :  { %3286 = vmatmul.mubr.f32.vlgmr.msra.gmra.mrb[56].mxu0 %v2610_v14 }
0x12ff   :  { %v2698_v19 = vpop.f32.mrb[56].mxu0 }
0x1300   :  { %v2699_v20 = vadd.f32 %v2772_v18, %v2698_v19  ;;  %v3287_v24 = vpop.f32.mrb[57].mxu0 }
0x1302   :  { %2703 = vst.msk [vmem:[%s4049_s6] sm:$0x3] %vm2702_vm11, %v2699_v20 }
0x1303   :  { %2708 = vsyncpa [#allocation3], 1 }
0x1304   :  { %2709 = vsyncpa [#allocation5], 1 }

</bundles_post_ra>
